<compile_context>
chip_gen: v5e
topology: v5e:2x2
jax: 0.10.0
libtpu: 0.0.40
codegen_flags: <defaults>
</compile_context>

<pallas_src>
import numpy as np
import jax
import jax.numpy as jnp
from jax.experimental import pallas as pl
from jax.experimental.pallas import tpu as pltpu

CONV_OUT = 32      # stands in for the module's conv_out = 512
BN_EPS = 1e-5


# ----------------------------------------------------------------------------
# Fused Pallas kernel: all 5 FPN levels, accumulator kept on-chip.
# ----------------------------------------------------------------------------
def _make_fused_kernel(num_levels):
    def kernel(*refs):
        x_refs = refs[:num_levels]                     # (1, Hk, Wk*Cin)  bf16
        ah_refs = refs[num_levels:2 * num_levels]      # (Ho, Hk)         bf16
        m_refs = refs[2 * num_levels:3 * num_levels]   # (Wk*Cin, Wo*Cout) bf16
        bias_ref = refs[3 * num_levels]                # (1, Wo*Cout)     f32
        out_ref = refs[3 * num_levels + 1]             # (1, Ho, Wo*Cout) f32

        acc = None
        for k in range(num_levels):
            x = x_refs[k][0]                                        # (Hk, Wk*Cin)
            # Separable H-interpolation (align_corners=True).
            t = jnp.dot(ah_refs[k][...], x,
                        preferred_element_type=jnp.float32)         # (Ho, Wk*Cin)
            # Fused W-interpolation + 1x1 conv (+ folded BN), lane-dense output.
            contrib = jnp.dot(t.astype(jnp.bfloat16), m_refs[k][...],
                              preferred_element_type=jnp.float32)   # (Ho, Wo*Cout)
            acc = contrib if acc is None else acc + contrib

        # Folded total bias added once (interp rows sum to 1 -> bias is invariant).
        out_ref[0] = acc + bias_ref[...]
    return kernel


def _fused_call(xs, ahs, ms, bias, n, ho, wo_cout):
    num_levels = len(xs)
    in_specs = []
    for x in xs:
        _, hk, wkcin = x.shape
        in_specs.append(pl.BlockSpec((1, hk, wkcin), lambda b: (b, 0, 0)))
    for ah in ahs:
        in_specs.append(pl.BlockSpec(ah.shape, lambda b: (0, 0)))
    for m in ms:
        in_specs.append(pl.BlockSpec(m.shape, lambda b: (0, 0)))
    in_specs.append(pl.BlockSpec(bias.shape, lambda b: (0, 0)))

    return pl.pallas_call(
        _make_fused_kernel(num_levels),
        out_shape=jax.ShapeDtypeStruct((n, ho, wo_cout), jnp.float32),
        grid=(n,),
        in_specs=in_specs,
        out_specs=pl.BlockSpec((1, ho, wo_cout), lambda b: (b, 0, 0)),
        compiler_params=pltpu.CompilerParams(
            dimension_semantics=("parallel",)),   # batch-independent -> v7x 2-TC sharding
    )(*xs, *ahs, *ms, bias)


# ----------------------------------------------------------------------------
# Host-side helpers: interpolation matrices, BN folding, operand preparation.
# ----------------------------------------------------------------------------
def _interp_matrix_1d(s_out, s_in):
    """1-D bilinear interpolation matrix, align_corners=True (torch semantics)."""
    a = np.zeros((s_out, s_in), dtype=np.float32)
    for i in range(s_out):
        src = 0.0 if s_out == 1 else i * (s_in - 1) / (s_out - 1)
        lo = int(np.floor(src))
        hi = min(lo + 1, s_in - 1)
        fr = src - lo
        a[i, lo] += 1.0 - fr
        a[i, hi] += fr
    return a


def _resize_matrix(h_out, w_out, h_in, w_in):
    return np.kron(_interp_matrix_1d(h_out, h_in),
                   _interp_matrix_1d(w_out, w_in)).astype(np.float32)


def make_params(key, in_channels, conv_out):
    """Deterministic synthetic conv1x1 + BatchNorm params, BN folded into conv."""
    params = []
    for k, cin in enumerate(in_channels):
        ks = jax.random.split(jax.random.fold_in(key, k), 6)
        w = 0.05 * jax.random.normal(ks[0], (cin, conv_out), jnp.float32)
        cb = 0.05 * jax.random.normal(ks[1], (conv_out,), jnp.float32)
        gamma = 1.0 + 0.1 * jax.random.normal(ks[2], (conv_out,), jnp.float32)
        beta = 0.1 * jax.random.normal(ks[3], (conv_out,), jnp.float32)
        rmean = 0.1 * jax.random.normal(ks[4], (conv_out,), jnp.float32)
        rvar = 1.0 + 0.1 * jnp.abs(jax.random.normal(ks[5], (conv_out,), jnp.float32))
        s = gamma / jnp.sqrt(rvar + BN_EPS)
        w_eff = w * s[None, :]
        b_eff = (cb - rmean) * s + beta
        params.append((w_eff, b_eff))
    return params


def prepare_level_operands(params, in_shapes, out_hw):
    """Precompute per-level A_h (bf16), M_k = kron(A_w^T, W_eff_k) (bf16) and the
    folded total bias laid out as (1, Wo*Cout) f32.  Done once, outside forward."""
    ho, wo = out_hw
    cout = params[0][0].shape[1]
    ahs, ms = [], []
    b_total = jnp.zeros((cout,), jnp.float32)
    for (w_eff, b_eff), (cin, hk, wk) in zip(params, in_shapes):
        ah = jnp.asarray(_interp_matrix_1d(ho, hk), jnp.float32)
        aw = jnp.asarray(_interp_matrix_1d(wo, wk), jnp.float32)
        m = jnp.kron(aw.T, w_eff)                       # (Wk*Cin, Wo*Cout)
        ahs.append(ah.astype(jnp.bfloat16))
        ms.append(m.astype(jnp.bfloat16))
        b_total = b_total + b_eff
    bias = jnp.tile(b_total, (wo,)).reshape(1, wo * cout)   # lane layout wo*Cout + co
    return ahs, ms, bias


def crnn_fpn_forward_pallas(cs, ahs, ms, bias):
    """cs = [c1..c5] in NCHW.  Returns x = sum_k resize(latconv_k(c_k)) in NCHW."""
    n = cs[0].shape[0]
    ho, wo = cs[1].shape[2], cs[1].shape[3]    # output spatial = c2's (torch _upsample_cat)
    cout = bias.shape[1] // wo
    xs = []
    for c in cs:
        _, cin, hk, wk = c.shape
        # channels-last, lane axis = (wk, cin), bf16 for MXU + halved DMA bytes
        xs.append(jnp.transpose(c, (0, 2, 3, 1))
                  .reshape(n, hk, wk * cin).astype(jnp.bfloat16))
    out = _fused_call(xs, ahs, ms, bias, n, ho, wo * cout)     # (N, Ho, Wo*Cout) f32
    return jnp.transpose(out.reshape(n, ho, wo, cout), (0, 3, 1, 2))   # back to NCHW


def crnn_fpn_forward_ref(cs, params):
    """Pure-JAX f32 reference (conv+BN then dense bilinear resize, then sum)."""
    n = cs[0].shape[0]
    ho, wo = cs[1].shape[2], cs[1].shape[3]
    cout = params[0][0].shape[1]
    acc = jnp.zeros((n, ho * wo, cout), jnp.float32)
    hi = jax.lax.Precision.HIGHEST
    for c, (w, b) in zip(cs, params):
        _, cin, hk, wk = c.shape
        x_flat = jnp.transpose(c, (0, 2, 3, 1)).reshape(n, hk * wk, cin)
        y = jnp.einsum('nsc,cd->nsd', x_flat, w, precision=hi) + b.reshape(1, 1, cout)
        r = jnp.asarray(_resize_matrix(ho, wo, hk, wk))
        acc = acc + jnp.einsum('os,nsd->nod', r, y, precision=hi)
    return jnp.transpose(acc.reshape(n, ho, wo, cout), (0, 3, 1, 2))


# ----------------------------------------------------------------------------
if __name__ == "__main__":
    key = jax.random.PRNGKey(0)

    # Small stand-ins for d['resnet18']['out'] = [32, 64, 128, 256, 512] and the
    # FPN spatial pyramid (c1 largest ... c5 smallest; output at c2's size).
    in_channels = [4, 8, 16, 32, 64]
    spatials = [(32, 32), (16, 16), (8, 8), (8, 8), (8, 8)]
    N = 2

    params = make_params(jax.random.fold_in(key, 123), in_channels, CONV_OUT)

    cs = []
    for k, (cin, (h, w)) in enumerate(zip(in_channels, spatials)):
        cs.append(jax.random.normal(jax.random.fold_in(key, 1000 + k),
                                    (N, cin, h, w), jnp.float32))

    out_hw = spatials[1]
    in_shapes = [(cin, h, w) for cin, (h, w) in zip(in_channels, spatials)]
    ahs, ms, bias = prepare_level_operands(params, in_shapes, out_hw)

    fwd = jax.jit(crnn_fpn_forward_pallas)
    out = jax.block_until_ready(fwd(cs, ahs, ms, bias))

    ref = jax.block_until_ready(crnn_fpn_forward_ref(cs, params))

    assert out.shape == (N, CONV_OUT, out_hw[0], out_hw[1]), out.shape
    np.testing.assert_allclose(np.asarray(out), np.asarray(ref),
                               rtol=3e-2, atol=3e-2)
    print("KERNEL_OK")
</pallas_src>

<mosaic_0001>
module attributes {stable_mosaic.version = 11 : i64} {
  func.func @kernel(%arg0: i32, %arg1: memref<1x32x128xbf16, #tpu.memory_space<vmem>>, %arg2: memref<1x16x128xbf16, #tpu.memory_space<vmem>>, %arg3: memref<1x8x128xbf16, #tpu.memory_space<vmem>>, %arg4: memref<1x8x256xbf16, #tpu.memory_space<vmem>>, %arg5: memref<1x8x512xbf16, #tpu.memory_space<vmem>>, %arg6: memref<16x32xbf16, #tpu.memory_space<vmem>>, %arg7: memref<16x16xbf16, #tpu.memory_space<vmem>>, %arg8: memref<16x8xbf16, #tpu.memory_space<vmem>>, %arg9: memref<16x8xbf16, #tpu.memory_space<vmem>>, %arg10: memref<16x8xbf16, #tpu.memory_space<vmem>>, %arg11: memref<128x512xbf16, #tpu.memory_space<vmem>>, %arg12: memref<128x512xbf16, #tpu.memory_space<vmem>>, %arg13: memref<128x512xbf16, #tpu.memory_space<vmem>>, %arg14: memref<256x512xbf16, #tpu.memory_space<vmem>>, %arg15: memref<512x512xbf16, #tpu.memory_space<vmem>>, %arg16: memref<1x512xf32, #tpu.memory_space<vmem>>, %arg17: memref<1x16x512xf32, #tpu.memory_space<vmem>>) attributes {dimension_semantics = [#tpu.dimension_semantics<parallel>], iteration_bounds = array<i64: 2>, scalar_prefetch = 0 : i64, scratch_operands = 0 : i64, tpu.core_type = #tpu.core_type<tc>, window_params = [{transform_indices = @transform_0, window_bounds = array<i64: 1, 32, 128>}, {transform_indices = @transform_1, window_bounds = array<i64: 1, 16, 128>}, {transform_indices = @transform_2, window_bounds = array<i64: 1, 8, 128>}, {transform_indices = @transform_3, window_bounds = array<i64: 1, 8, 256>}, {transform_indices = @transform_4, window_bounds = array<i64: 1, 8, 512>}, {pipeline_mode = #tpu.pipeline_mode<synchronous>, transform_indices = @transform_5, window_bounds = array<i64: 16, 32>}, {pipeline_mode = #tpu.pipeline_mode<synchronous>, transform_indices = @transform_6, window_bounds = array<i64: 16, 16>}, {pipeline_mode = #tpu.pipeline_mode<synchronous>, transform_indices = @transform_7, window_bounds = array<i64: 16, 8>}, {pipeline_mode = #tpu.pipeline_mode<synchronous>, transform_indices = @transform_8, window_bounds = array<i64: 16, 8>}, {pipeline_mode = #tpu.pipeline_mode<synchronous>, transform_indices = @transform_9, window_bounds = array<i64: 16, 8>}, {pipeline_mode = #tpu.pipeline_mode<synchronous>, transform_indices = @transform_10, window_bounds = array<i64: 128, 512>}, {pipeline_mode = #tpu.pipeline_mode<synchronous>, transform_indices = @transform_11, window_bounds = array<i64: 128, 512>}, {pipeline_mode = #tpu.pipeline_mode<synchronous>, transform_indices = @transform_12, window_bounds = array<i64: 128, 512>}, {pipeline_mode = #tpu.pipeline_mode<synchronous>, transform_indices = @transform_13, window_bounds = array<i64: 256, 512>}, {pipeline_mode = #tpu.pipeline_mode<synchronous>, transform_indices = @transform_14, window_bounds = array<i64: 512, 512>}, {pipeline_mode = #tpu.pipeline_mode<synchronous>, transform_indices = @transform_15, window_bounds = array<i64: 1, 512>}, {transform_indices = @transform_16, window_bounds = array<i64: 1, 16, 512>}]} {
    %c0 = arith.constant 0 : index
    %c0_0 = arith.constant 0 : index
    %c0_1 = arith.constant 0 : index
    %0 = vector.load %arg1[%c0, %c0_0, %c0_1] : memref<1x32x128xbf16, #tpu.memory_space<vmem>>, vector<1x32x128xbf16>
    %1 = vector.shape_cast %0 : vector<1x32x128xbf16> to vector<32x128xbf16>
    %c0_2 = arith.constant 0 : index
    %c0_3 = arith.constant 0 : index
    %2 = vector.load %arg6[%c0_2, %c0_3] : memref<16x32xbf16, #tpu.memory_space<vmem>>, vector<16x32xbf16>
    %cst = arith.constant dense<0.000000e+00> : vector<16x128xf32>
    %3 = tpu.matmul %2, %1, %cst {dimension_numbers = #tpu.dot_dimension_numbers<[1], [0], [0], [1], [0, 0, 1, 1], [], []>} : vector<16x32xbf16>, vector<32x128xbf16>, vector<16x128xf32> -> vector<16x128xf32>
    %4 = arith.truncf %3 : vector<16x128xf32> to vector<16x128xbf16>
    %c0_4 = arith.constant 0 : index
    %c0_5 = arith.constant 0 : index
    %5 = vector.load %arg11[%c0_4, %c0_5] : memref<128x512xbf16, #tpu.memory_space<vmem>>, vector<128x512xbf16>
    %cst_6 = arith.constant dense<0.000000e+00> : vector<16x512xf32>
    %6 = tpu.matmul %4, %5, %cst_6 {dimension_numbers = #tpu.dot_dimension_numbers<[1], [0], [0], [1], [0, 0, 1, 1], [], []>} : vector<16x128xbf16>, vector<128x512xbf16>, vector<16x512xf32> -> vector<16x512xf32>
    %c0_7 = arith.constant 0 : index
    %c0_8 = arith.constant 0 : index
    %c0_9 = arith.constant 0 : index
    %7 = vector.load %arg2[%c0_7, %c0_8, %c0_9] : memref<1x16x128xbf16, #tpu.memory_space<vmem>>, vector<1x16x128xbf16>
    %8 = vector.shape_cast %7 : vector<1x16x128xbf16> to vector<16x128xbf16>
    %c0_10 = arith.constant 0 : index
    %c0_11 = arith.constant 0 : index
    %9 = vector.load %arg7[%c0_10, %c0_11] : memref<16x16xbf16, #tpu.memory_space<vmem>>, vector<16x16xbf16>
    %cst_12 = arith.constant dense<0.000000e+00> : vector<16x128xf32>
    %10 = tpu.matmul %9, %8, %cst_12 {dimension_numbers = #tpu.dot_dimension_numbers<[1], [0], [0], [1], [0, 0, 1, 1], [], []>} : vector<16x16xbf16>, vector<16x128xbf16>, vector<16x128xf32> -> vector<16x128xf32>
    %11 = arith.truncf %10 : vector<16x128xf32> to vector<16x128xbf16>
    %c0_13 = arith.constant 0 : index
    %c0_14 = arith.constant 0 : index
    %12 = vector.load %arg12[%c0_13, %c0_14] : memref<128x512xbf16, #tpu.memory_space<vmem>>, vector<128x512xbf16>
    %cst_15 = arith.constant dense<0.000000e+00> : vector<16x512xf32>
    %13 = tpu.matmul %11, %12, %cst_15 {dimension_numbers = #tpu.dot_dimension_numbers<[1], [0], [0], [1], [0, 0, 1, 1], [], []>} : vector<16x128xbf16>, vector<128x512xbf16>, vector<16x512xf32> -> vector<16x512xf32>
    %14 = arith.addf %6, %13 : vector<16x512xf32>
    %c0_16 = arith.constant 0 : index
    %c0_17 = arith.constant 0 : index
    %c0_18 = arith.constant 0 : index
    %15 = vector.load %arg3[%c0_16, %c0_17, %c0_18] : memref<1x8x128xbf16, #tpu.memory_space<vmem>>, vector<1x8x128xbf16>
    %16 = vector.shape_cast %15 : vector<1x8x128xbf16> to vector<8x128xbf16>
    %c0_19 = arith.constant 0 : index
    %c0_20 = arith.constant 0 : index
    %17 = vector.load %arg8[%c0_19, %c0_20] : memref<16x8xbf16, #tpu.memory_space<vmem>>, vector<16x8xbf16>
    %cst_21 = arith.constant dense<0.000000e+00> : vector<16x128xf32>
    %18 = tpu.matmul %17, %16, %cst_21 {dimension_numbers = #tpu.dot_dimension_numbers<[1], [0], [0], [1], [0, 0, 1, 1], [], []>} : vector<16x8xbf16>, vector<8x128xbf16>, vector<16x128xf32> -> vector<16x128xf32>
    %19 = arith.truncf %18 : vector<16x128xf32> to vector<16x128xbf16>
    %c0_22 = arith.constant 0 : index
    %c0_23 = arith.constant 0 : index
    %20 = vector.load %arg13[%c0_22, %c0_23] : memref<128x512xbf16, #tpu.memory_space<vmem>>, vector<128x512xbf16>
    %cst_24 = arith.constant dense<0.000000e+00> : vector<16x512xf32>
    %21 = tpu.matmul %19, %20, %cst_24 {dimension_numbers = #tpu.dot_dimension_numbers<[1], [0], [0], [1], [0, 0, 1, 1], [], []>} : vector<16x128xbf16>, vector<128x512xbf16>, vector<16x512xf32> -> vector<16x512xf32>
    %22 = arith.addf %14, %21 : vector<16x512xf32>
    %c0_25 = arith.constant 0 : index
    %c0_26 = arith.constant 0 : index
    %c0_27 = arith.constant 0 : index
    %23 = vector.load %arg4[%c0_25, %c0_26, %c0_27] : memref<1x8x256xbf16, #tpu.memory_space<vmem>>, vector<1x8x256xbf16>
    %24 = vector.shape_cast %23 : vector<1x8x256xbf16> to vector<8x256xbf16>
    %c0_28 = arith.constant 0 : index
    %c0_29 = arith.constant 0 : index
    %25 = vector.load %arg9[%c0_28, %c0_29] : memref<16x8xbf16, #tpu.memory_space<vmem>>, vector<16x8xbf16>
    %cst_30 = arith.constant dense<0.000000e+00> : vector<16x256xf32>
    %26 = tpu.matmul %25, %24, %cst_30 {dimension_numbers = #tpu.dot_dimension_numbers<[1], [0], [0], [1], [0, 0, 1, 1], [], []>} : vector<16x8xbf16>, vector<8x256xbf16>, vector<16x256xf32> -> vector<16x256xf32>
    %27 = arith.truncf %26 : vector<16x256xf32> to vector<16x256xbf16>
    %c0_31 = arith.constant 0 : index
    %c0_32 = arith.constant 0 : index
    %28 = vector.load %arg14[%c0_31, %c0_32] : memref<256x512xbf16, #tpu.memory_space<vmem>>, vector<256x512xbf16>
    %cst_33 = arith.constant dense<0.000000e+00> : vector<16x512xf32>
    %29 = tpu.matmul %27, %28, %cst_33 {dimension_numbers = #tpu.dot_dimension_numbers<[1], [0], [0], [1], [0, 0, 1, 1], [], []>} : vector<16x256xbf16>, vector<256x512xbf16>, vector<16x512xf32> -> vector<16x512xf32>
    %30 = arith.addf %22, %29 : vector<16x512xf32>
    %c0_34 = arith.constant 0 : index
    %c0_35 = arith.constant 0 : index
    %c0_36 = arith.constant 0 : index
    %31 = vector.load %arg5[%c0_34, %c0_35, %c0_36] : memref<1x8x512xbf16, #tpu.memory_space<vmem>>, vector<1x8x512xbf16>
    %32 = vector.shape_cast %31 : vector<1x8x512xbf16> to vector<8x512xbf16>
    %c0_37 = arith.constant 0 : index
    %c0_38 = arith.constant 0 : index
    %33 = vector.load %arg10[%c0_37, %c0_38] : memref<16x8xbf16, #tpu.memory_space<vmem>>, vector<16x8xbf16>
    %cst_39 = arith.constant dense<0.000000e+00> : vector<16x512xf32>
    %34 = tpu.matmul %33, %32, %cst_39 {dimension_numbers = #tpu.dot_dimension_numbers<[1], [0], [0], [1], [0, 0, 1, 1], [], []>} : vector<16x8xbf16>, vector<8x512xbf16>, vector<16x512xf32> -> vector<16x512xf32>
    %35 = arith.truncf %34 : vector<16x512xf32> to vector<16x512xbf16>
    %c0_40 = arith.constant 0 : index
    %c0_41 = arith.constant 0 : index
    %36 = vector.load %arg15[%c0_40, %c0_41] : memref<512x512xbf16, #tpu.memory_space<vmem>>, vector<512x512xbf16>
    %cst_42 = arith.constant dense<0.000000e+00> : vector<16x512xf32>
    %37 = tpu.matmul %35, %36, %cst_42 {dimension_numbers = #tpu.dot_dimension_numbers<[1], [0], [0], [1], [0, 0, 1, 1], [], []>} : vector<16x512xbf16>, vector<512x512xbf16>, vector<16x512xf32> -> vector<16x512xf32>
    %38 = arith.addf %30, %37 : vector<16x512xf32>
    %c0_43 = arith.constant 0 : index
    %c0_44 = arith.constant 0 : index
    %39 = vector.load %arg16[%c0_43, %c0_44] : memref<1x512xf32, #tpu.memory_space<vmem>>, vector<1x512xf32>
    %40 = vector.broadcast %39 : vector<1x512xf32> to vector<16x512xf32>
    %41 = arith.addf %38, %40 : vector<16x512xf32>
    %c0_45 = arith.constant 0 : index
    %c0_46 = arith.constant 0 : index
    %c0_47 = arith.constant 0 : index
    %42 = vector.load %arg17[%c0_45, %c0_46, %c0_47] : memref<1x16x512xf32, #tpu.memory_space<vmem>>, vector<1x16x512xf32>
    %43 = vector.shape_cast %42 : vector<1x16x512xf32> to vector<16x512xf32>
    %44 = vector.shape_cast %41 : vector<16x512xf32> to vector<1x16x512xf32>
    tpu.vector_store %arg17[%c0_45, %c0_46, %c0_47], %44 {strides = array<i32>} : memref<1x16x512xf32, #tpu.memory_space<vmem>>, vector<1x16x512xf32>,
    return
  }
  func.func @transform_0(%arg0: i32) -> (i32, i32, i32) {
    %c0_i32 = arith.constant 0 : i32
    %c0_i32_0 = arith.constant 0 : i32
    %c0_i32_1 = arith.constant 0 : i32
    return %arg0, %c0_i32, %c0_i32_0 : i32, i32, i32
  }
  func.func @transform_1(%arg0: i32) -> (i32, i32, i32) {
    %c0_i32 = arith.constant 0 : i32
    %c0_i32_0 = arith.constant 0 : i32
    %c0_i32_1 = arith.constant 0 : i32
    return %arg0, %c0_i32, %c0_i32_0 : i32, i32, i32
  }
  func.func @transform_2(%arg0: i32) -> (i32, i32, i32) {
    %c0_i32 = arith.constant 0 : i32
    %c0_i32_0 = arith.constant 0 : i32
    %c0_i32_1 = arith.constant 0 : i32
    return %arg0, %c0_i32, %c0_i32_0 : i32, i32, i32
  }
  func.func @transform_3(%arg0: i32) -> (i32, i32, i32) {
    %c0_i32 = arith.constant 0 : i32
    %c0_i32_0 = arith.constant 0 : i32
    %c0_i32_1 = arith.constant 0 : i32
    return %arg0, %c0_i32, %c0_i32_0 : i32, i32, i32
  }
  func.func @transform_4(%arg0: i32) -> (i32, i32, i32) {
    %c0_i32 = arith.constant 0 : i32
    %c0_i32_0 = arith.constant 0 : i32
    %c0_i32_1 = arith.constant 0 : i32
    return %arg0, %c0_i32, %c0_i32_0 : i32, i32, i32
  }
  func.func @transform_5(%arg0: i32) -> (i32, i32) {
    %c0_i32 = arith.constant 0 : i32
    %c0_i32_0 = arith.constant 0 : i32
    %c0_i32_1 = arith.constant 0 : i32
    return %c0_i32, %c0_i32_0 : i32, i32
  }
  func.func @transform_6(%arg0: i32) -> (i32, i32) {
    %c0_i32 = arith.constant 0 : i32
    %c0_i32_0 = arith.constant 0 : i32
    %c0_i32_1 = arith.constant 0 : i32
    return %c0_i32, %c0_i32_0 : i32, i32
  }
  func.func @transform_7(%arg0: i32) -> (i32, i32) {
    %c0_i32 = arith.constant 0 : i32
    %c0_i32_0 = arith.constant 0 : i32
    %c0_i32_1 = arith.constant 0 : i32
    return %c0_i32, %c0_i32_0 : i32, i32
  }
  func.func @transform_8(%arg0: i32) -> (i32, i32) {
    %c0_i32 = arith.constant 0 : i32
    %c0_i32_0 = arith.constant 0 : i32
    %c0_i32_1 = arith.constant 0 : i32
    return %c0_i32, %c0_i32_0 : i32, i32
  }
  func.func @transform_9(%arg0: i32) -> (i32, i32) {
    %c0_i32 = arith.constant 0 : i32
    %c0_i32_0 = arith.constant 0 : i32
    %c0_i32_1 = arith.constant 0 : i32
    return %c0_i32, %c0_i32_0 : i32, i32
  }
  func.func @transform_10(%arg0: i32) -> (i32, i32) {
    %c0_i32 = arith.constant 0 : i32
    %c0_i32_0 = arith.constant 0 : i32
    %c0_i32_1 = arith.constant 0 : i32
    return %c0_i32, %c0_i32_0 : i32, i32
  }
  func.func @transform_11(%arg0: i32) -> (i32, i32) {
    %c0_i32 = arith.constant 0 : i32
    %c0_i32_0 = arith.constant 0 : i32
    %c0_i32_1 = arith.constant 0 : i32
    return %c0_i32, %c0_i32_0 : i32, i32
  }
  func.func @transform_12(%arg0: i32) -> (i32, i32) {
    %c0_i32 = arith.constant 0 : i32
    %c0_i32_0 = arith.constant 0 : i32
    %c0_i32_1 = arith.constant 0 : i32
    return %c0_i32, %c0_i32_0 : i32, i32
  }
  func.func @transform_13(%arg0: i32) -> (i32, i32) {
    %c0_i32 = arith.constant 0 : i32
    %c0_i32_0 = arith.constant 0 : i32
    %c0_i32_1 = arith.constant 0 : i32
    return %c0_i32, %c0_i32_0 : i32, i32
  }
  func.func @transform_14(%arg0: i32) -> (i32, i32) {
    %c0_i32 = arith.constant 0 : i32
    %c0_i32_0 = arith.constant 0 : i32
    %c0_i32_1 = arith.constant 0 : i32
    return %c0_i32, %c0_i32_0 : i32, i32
  }
  func.func @transform_15(%arg0: i32) -> (i32, i32) {
    %c0_i32 = arith.constant 0 : i32
    %c0_i32_0 = arith.constant 0 : i32
    %c0_i32_1 = arith.constant 0 : i32
    return %c0_i32, %c0_i32_0 : i32, i32
  }
  func.func @transform_16(%arg0: i32) -> (i32, i32, i32) {
    %c0_i32 = arith.constant 0 : i32
    %c0_i32_0 = arith.constant 0 : i32
    %c0_i32_1 = arith.constant 0 : i32
    return %arg0, %c0_i32, %c0_i32_0 : i32, i32, i32
  }
}

</mosaic_0001>

<bundles_post_ra>
// kernel: crnn_fpn_forward_pallas.1
= control target key start
LH: loop header
LB: loop body
LE: loop exit
PB: predicated region body
PF: predicated region fallthrough
CT: control target
= control target key end

     0   :  { %s6096_s0 = inlined_call_operand.vmem [shape: bf16[2,32,128], index: 0, kind: input, shape index: {}]   ;;  %s6097_s1 = inlined_call_operand.vmem [shape: bf16[2,16,128], index: 1, kind: input, shape index: {}]   ;;  %s6098_s2 = inlined_call_operand.vmem [shape: bf16[2,8,128], index: 2, kind: input, shape index: {}]   ;;  %s6099_s3 = inlined_call_operand.vmem [shape: bf16[2,8,256], index: 3, kind: input, shape index: {}]   ;;  %s6100_s4 = inlined_call_operand.vmem [shape: bf16[2,8,512], index: 4, kind: input, shape index: {}]   ;;  %s6101_s5 = inlined_call_operand.vmem [shape: bf16[16,32], index: 5, kind: input, shape index: {}]   ;;  %s6102_s6 = inlined_call_operand.vmem [shape: bf16[16,16], index: 6, kind: input, shape index: {}]   ;;  %s6103_s7 = inlined_call_operand.vmem [shape: bf16[16,8], index: 7, kind: input, shape index: {}]   ;;  %s6104_s8 = inlined_call_operand.vmem [shape: bf16[16,8], index: 8, kind: input, shape index: {}]   ;;  %s6105_s9 = inlined_call_operand.vmem [shape: bf16[16,8], index: 9, kind: input, shape index: {}]   ;;  %s6106_s10 = inlined_call_operand.vmem [shape: bf16[128,512], index: 10, kind: input, shape index: {}]   ;;  %s6107_s11 = inlined_call_operand.vmem [shape: bf16[128,512], index: 11, kind: input, shape index: {}]   ;;  %s6108_s12 = inlined_call_operand.vmem [shape: bf16[128,512], index: 12, kind: input, shape index: {}]   ;;  %s6109_s13 = inlined_call_operand.vmem [shape: bf16[256,512], index: 13, kind: input, shape index: {}]   ;;  %s6110_s14 = inlined_call_operand.hbm [shape: bf16[512,512], index: 14, kind: input, shape index: {}]   ;;  %s6111_s15 = inlined_call_operand.vmem [shape: f32[1,512], index: 15, kind: input, shape index: {}]   ;;  %s6112_s16 = inlined_call_operand.vmem [shape: f32[2,16,512], index: 16, kind: output, shape index: {}]  }
   0x1   :  { %6113 = sst [smem:[#allocation5_spill]] %s6096_s0 }
   0x2   :  { %21 = vsyncpa [#allocation3], 0  ;;  %s4932_s21 = smov 0  }
   0x3 LB: > { %s457_s24 = sshll.u32 %s6110_s14, 4  ;;  %s3267_s25 = sadd.s32 4294967295, %s4842_s21   ;;  %s4842_s21 = sphi %s4932_s21, %s27_s21   ;;  %s458_s24 = int_to_ptr.hbm [resolvable:$true] %s457_s24 }
   0x4   : > { %p3269_p0 = scmp.ge.s32.totalorder %s4842_s21, 1  ;;  %p419_p1 = scmp.lt.s32.totalorder %s4842_s21, 3 }
   0x5   : > { %p4789_p2 = scmp.eq.s32.totalorder %s3267_s25, 0  ;;  %s4844_s26 = smov [#allocation2]  }
   0x6   : > { %p420_p3 = pnand %p3269_p0, %p419_p1  ;;  %s459_s27 = sshll.u32 %s4844_s26, 4  ;;  %s460_s27 = int_to_ptr.vmem [resolvable:$true] %s459_s27 }
   0x7   : > { %s4845_s28 = smov 256   ;;  %s4846_s29 = smov 16  }
   0x8   : > { %p4785_p4 = pneg %p420_p3  ;;  %517 = sbr.rel (%p420_p3) target bundleno = 878 (0x36e), region = 84 }
   0xa   : > { %p4786_p5 = pnand %p4789_p2, %p4785_p4 }
   0xc   : > { %4788 = dma.hbm_to_vmem [thread:$0]  (!%p4786_p5), %s458_s24, 16384, %s460_s27, [#allocation3], %s4845_s28, %s4845_s28, %s4846_s29  }
   0xd   : > { %4837 = dma.done.wait (%p4789_p2), [#allocation3], 16384  }
   0xe   : > { %4839 = vsyncadd (%p4789_p2), [#allocation3], 4294950912  ;;  %p587_p6 = scmp.lt.s32.totalorder %s3267_s25, 1  ;;  %s6114_s23 = sld [smem:[#allocation5_spill]]  ;;  %v4521_v1 = vld [vmem:[%s6102_s6] sm:$0xff]  ;;  %vm706_vm0 = vcmask 130048  }
   0xf   : > { %vm640_vm1 = vcmask 261120   ;;  %v3421_v4 = vld [vmem:[%s6107_s11 + $0xe0] sm:$0xf]  ;;  %v4552_v5 = vld [vmem:[%s6107_s11 + $0xec] sm:$0xf0]  ;;  %vm1201_vm2 = vcmask 1043456  }
  0x10   : > { %s6116_s25 = smov (!%p587_p6, %s3267_s25), 1  ;;  %v4550_v6 = vld [vmem:[%s6107_s11 + $0xe4] sm:$0xf]  ;;  %v3422_v7 = vor.u32 %v4552_v5, %v3421_v4  ;;  %v3423_v8 = vld [vmem:[%s6107_s11 + $0xf0] sm:$0xf0]  ;;  %vm1197_vm3 = vcmask 64512  }
  0x11   : > { %s4481_s30 = sshll.u32 %s6116_s25, 3  ;;  %s4480_s19 = sshll.u32 %s6116_s25, 4  ;;  %v3429_v9 = vld [vmem:[%s6107_s11 + $0xe8] sm:$0xf]  ;;  %v4553_v10 = vld [vmem:[%s6107_s11 + $0xf4] sm:$0xf0]  ;;  %v3426_v12 = vor.u32 %v4550_v6, %v3423_v8 }
  0x12   : > { %s596_s18 = scalar_lea.vmem %s6097_s1, %s4481_s30  ;;  %v4487_v11 = vld [vmem:[%s6101_s5] sm:$0xff]  ;;  %v3430_v13 = vor.u32 %v4553_v10, %v3429_v9  ;;  %v4551_v14 = vld [vmem:[%s6107_s11 + $0xec] sm:$0xf]  ;;  %v3431_v15 = vld [vmem:[%s6107_s11 + $0xf8] sm:$0xf0]  ;;  %917 = vmatpush.bf16.msra.mxu2 %v3422_v7  ;;  %s3278_s20 = sshll.u32 %s6116_s25, 2 }
  0x13   : > { %v4520_v0 = vld [vmem:[%s596_s18] sm:$0xff]  ;;  %v3434_v17 = vor.u32 %v4551_v14, %v3431_v15  ;;  %v4548_v18 = vld [vmem:[%s6107_s11 + $0xcc] sm:$0xf0]  ;;  %v3407_v20 = vld [vmem:[%s6107_s11 + $0xd0] sm:$0xf0]  ;;  %931 = vmatpush.bf16.msra.mxu3 %v3426_v12  ;;  %s605_s18 = scalar_lea.vmem %s6099_s3, %s4481_s30  ;;  %s610_s22 = scalar_lea.vmem %s6100_s4, %s4480_s19 }
  0x14   : > { %s591_s24 = scalar_lea.vmem %s6114_s23, %s4480_s19  ;;  %717 = vmatpush.bf16.msra.mxu1 %v4520_v0  ;;  %v3405_v16 = vld [vmem:[%s6107_s11 + $0xc0] sm:$0xf]  ;;  %v4546_v19 = vld [vmem:[%s6107_s11 + $0xc4] sm:$0xf]  ;;  %v3413_v23 = vld [vmem:[%s6107_s11 + $0xc8] sm:$0xf] }
  0x15   : > { %v4486_v2 = vld [vmem:[%s591_s24 + $0x8] sm:$0xff]  ;;  %v4485_v3 = vld [vmem:[%s591_s24] sm:$0xff]  ;;  %v3406_v21 = vor.u32 %v4548_v18, %v3405_v16  ;;  %v3410_v22 = vor.u32 %v4546_v19, %v3407_v20  ;;  %v4549_v24 = vld [vmem:[%s6107_s11 + $0xd4] sm:$0xf0]  ;;  %s600_s24 = scalar_lea.vmem %s6098_s2, %s3278_s20 }
  0x16   : > { %650 = vmatpush.bf16.msra.mxu0 %v4486_v2  ;;  %v4547_v25 = vld [vmem:[%s6107_s11 + $0xcc] sm:$0xf]  ;;  %v3414_v26 = vor.u32 %v4549_v24, %v3413_v23  ;;  %v3415_v27 = vld [vmem:[%s6107_s11 + $0xd8] sm:$0xf0]  ;;  %v3389_v28 = vld [vmem:[%s6107_s11 + $0xa0] sm:$0xf] }
  0x17   : > { %3306 = vmatmul.msk.bf16.vlgmr.msra.gmra.mxu1 %vm706_vm0, %v4521_v1  ;;  %v4544_v29 = vld [vmem:[%s6107_s11 + $0xac] sm:$0xf0]  ;;  %v3418_v30 = vor.u32 %v4547_v25, %v3415_v27  ;;  %v4542_v31 = vld [vmem:[%s6107_s11 + $0xa4] sm:$0xf]  ;;  %v3391_v32 = vld [vmem:[%s6107_s11 + $0xb0] sm:$0xf0]  ;;  %918 = vmatpush.bf16.msra.mxu2 %v3406_v21 }
  0x18   : > { %945 = vmatpush.bf16.msrb.mxu1 %v3430_v13  ;;  %v3397_v33 = vld [vmem:[%s6107_s11 + $0xa8] sm:$0xf]  ;;  %v3390_v34 = vor.u32 %v4544_v29, %v3389_v28  ;;  %v4545_v35 = vld [vmem:[%s6107_s11 + $0xb4] sm:$0xf0]  ;;  %v4543_v36 = vld [vmem:[%s6107_s11 + $0xac] sm:$0xf]  ;;  %932 = vmatpush.bf16.msra.mxu3 %v3410_v22  ;;  %v3394_v38 = vor.u32 %v4542_v31, %v3391_v32 }
  0x19   : > { %v3399_v37 = vld [vmem:[%s6107_s11 + $0xb8] sm:$0xf0]  ;;  %v3373_v39 = vld [vmem:[%s6107_s11 + $0x80] sm:$0xf]  ;;  %v4540_v40 = vld [vmem:[%s6107_s11 + $0x8c] sm:$0xf0]  ;;  %v3398_v41 = vor.u32 %v4545_v35, %v3397_v33 }
  0x1a   : > { %651 = vmatpush.bf16.msra.mxu0 %v4485_v3  ;;  %v4538_v42 = vld [vmem:[%s6107_s11 + $0x84] sm:$0xf]  ;;  %v3375_v43 = vld [vmem:[%s6107_s11 + $0x90] sm:$0xf0]  ;;  %v3402_v44 = vor.u32 %v4543_v36, %v3399_v37  ;;  %v3381_v45 = vld [vmem:[%s6107_s11 + $0x88] sm:$0xf]  ;;  %v3374_v47 = vor.u32 %v4540_v40, %v3373_v39 }
  0x1b   : > { %v4541_v46 = vld [vmem:[%s6107_s11 + $0x94] sm:$0xf0]  ;;  %919 = vmatpush.bf16.msra.mxu2 %v3390_v34  ;;  %v4539_v48 = vld [vmem:[%s6107_s11 + $0x8c] sm:$0xf]  ;;  %v3383_v49 = vld [vmem:[%s6107_s11 + $0x98] sm:$0xf0]  ;;  %v3378_v50 = vor.u32 %v4538_v42, %v3375_v43 }
  0x1c   : > { %946 = vmatpush.bf16.msrb.mxu1 %v3414_v26  ;;  %933 = vmatpush.bf16.msra.mxu3 %v3394_v38  ;;  %v3357_v51 = vld [vmem:[%s6107_s11 + $0x60] sm:$0xf]  ;;  %v4536_v52 = vld [vmem:[%s6107_s11 + $0x6c] sm:$0xf0]  ;;  %v3382_v53 = vor.u32 %v4541_v46, %v3381_v45  ;;  %v4534_v54 = vld [vmem:[%s6107_s11 + $0x64] sm:$0xf]  ;;  %v3386_v56 = vor.u32 %v4539_v48, %v3383_v49 }
  0x1d   : > { %3297 = vmatmul.msk.bf16.vlgmr.msra.gmra.mxu0 %vm640_vm1, %v4487_v11  ;;  %v3359_v55 = vld [vmem:[%s6107_s11 + $0x70] sm:$0xf0]  ;;  %v3365_v57 = vld [vmem:[%s6107_s11 + $0x68] sm:$0xf]  ;;  %v4537_v58 = vld [vmem:[%s6107_s11 + $0x74] sm:$0xf0]  ;;  %v3358_v59 = vor.u32 %v4536_v52, %v3357_v51 }
  0x1e   : > { %959 = vmatpush.bf16.msrb.mxu0 %v3434_v17  ;;  %v4535_v60 = vld [vmem:[%s6107_s11 + $0x6c] sm:$0xf]  ;;  %v3367_v61 = vld [vmem:[%s6107_s11 + $0x78] sm:$0xf0]  ;;  %v3362_v62 = vor.u32 %v4534_v54, %v3359_v55  ;;  %v3341_v63 = vld [vmem:[%s6107_s11 + $0x40] sm:$0xf]  ;;  %v3366_v1 = vor.u32 %v4537_v58, %v3365_v57 }
  0x1f   : > { %920 = vmatpush.bf16.msra.mxu2 %v3374_v47  ;;  %v4532_v0 = vld [vmem:[%s6107_s11 + $0x4c] sm:$0xf0]  ;;  %v4530_v2 = vld [vmem:[%s6107_s11 + $0x44] sm:$0xf]  ;;  %v3343_v3 = vld [vmem:[%s6107_s11 + $0x50] sm:$0xf0]  ;;  %v3370_v4 = vor.u32 %v4535_v60, %v3367_v61 }
  0x20   : > { %947 = vmatpush.bf16.msrb.mxu1 %v3398_v41  ;;  %934 = vmatpush.bf16.msra.mxu3 %v3378_v50  ;;  %v3349_v5 = vld [vmem:[%s6107_s11 + $0x48] sm:$0xf]  ;;  %v4533_v6 = vld [vmem:[%s6107_s11 + $0x54] sm:$0xf0]  ;;  %v3342_v7 = vor.u32 %v4532_v0, %v3341_v63  ;;  %v4531_v8 = vld [vmem:[%s6107_s11 + $0x4c] sm:$0xf]  ;;  %v3346_v10 = vor.u32 %v4530_v2, %v3343_v3 }
  0x21   : > { %v3351_v9 = vld [vmem:[%s6107_s11 + $0x58] sm:$0xf0]  ;;  %v3325_v11 = vld [vmem:[%s6107_s11 + $0x20] sm:$0xf]  ;;  %v4528_v12 = vld [vmem:[%s6107_s11 + $0x2c] sm:$0xf0]  ;;  %v3350_v13 = vor.u32 %v4533_v6, %v3349_v5 }
  0x22   : > { %960 = vmatpush.bf16.msrb.mxu0 %v3418_v30  ;;  %v4526_v14 = vld [vmem:[%s6107_s11 + $0x24] sm:$0xf]  ;;  %v3327_v15 = vld [vmem:[%s6107_s11 + $0x30] sm:$0xf0]  ;;  %v3354_v16 = vor.u32 %v4531_v8, %v3351_v9  ;;  %v3333_v17 = vld [vmem:[%s6107_s11 + $0x28] sm:$0xf]  ;;  %v3326_v20 = vor.u32 %v4528_v12, %v3325_v11 }
  0x23   : > { %921 = vmatpush.bf16.msra.mxu2 %v3358_v59  ;;  %v4529_v18 = vld [vmem:[%s6107_s11 + $0x34] sm:$0xf0]  ;;  %v4527_v19 = vld [vmem:[%s6107_s11 + $0x2c] sm:$0xf]  ;;  %v3335_v21 = vld [vmem:[%s6107_s11 + $0x38] sm:$0xf0]  ;;  %v3330_v24 = vor.u32 %v4526_v14, %v3327_v15 }
  0x24   : > { %948 = vmatpush.bf16.msrb.mxu1 %v3382_v53  ;;  %935 = vmatpush.bf16.msra.mxu3 %v3362_v62  ;;  %v3309_v22 = vld [vmem:[%s6107_s11] sm:$0xf]  ;;  %v4524_v23 = vld [vmem:[%s6107_s11 + $0xc] sm:$0xf0]  ;;  %v4522_v25 = vld [vmem:[%s6107_s11 + $0x4] sm:$0xf]  ;;  %v3334_v28 = vor.u32 %v4529_v18, %v3333_v17  ;;  %v3338_v32 = vor.u32 %v4527_v19, %v3335_v21 }
  0x25   : > { %v3311_v26 = vld [vmem:[%s6107_s11 + $0x10] sm:$0xf0]  ;;  %v3317_v27 = vld [vmem:[%s6107_s11 + $0x8] sm:$0xf]  ;;  %v4525_v29 = vld [vmem:[%s6107_s11 + $0x14] sm:$0xf0]  ;;  %v3310_v36 = vor.u32 %v4524_v23, %v3309_v22 }
  0x26   : > { %961 = vmatpush.bf16.msrb.mxu0 %v3402_v44  ;;  %v3549_v30 = vld [vmem:[%s6106_s10 + $0xe0] sm:$0xf]  ;;  %v4518_v31 = vld [vmem:[%s6106_s10 + $0xec] sm:$0xf0]  ;;  %v4523_v33 = vld [vmem:[%s6107_s11 + $0xc] sm:$0xf]  ;;  %v3314_v40 = vor.u32 %v4522_v25, %v3311_v26  ;;  %v3318_v44 = vor.u32 %v4525_v29, %v3317_v27 }
  0x27   : > { %922 = vmatpush.bf16.msra.mxu2 %v3342_v7  ;;  %v4516_v34 = vld [vmem:[%s6106_s10 + $0xe4] sm:$0xf]  ;;  %v3551_v35 = vld [vmem:[%s6106_s10 + $0xf0] sm:$0xf0]  ;;  %v3319_v37 = vld [vmem:[%s6107_s11 + $0x18] sm:$0xf0]  ;;  %v3550_v41 = vor.u32 %v4518_v31, %v3549_v30 }
  0x28   : > { %949 = vmatpush.bf16.msrb.mxu1 %v3366_v1  ;;  %936 = vmatpush.bf16.msra.mxu3 %v3346_v10  ;;  %v3557_v38 = vld [vmem:[%s6106_s10 + $0xe8] sm:$0xf]  ;;  %v4519_v39 = vld [vmem:[%s6106_s10 + $0xf4] sm:$0xf0]  ;;  %v4517_v42 = vld [vmem:[%s6106_s10 + $0xec] sm:$0xf]  ;;  %v3554_v45 = vor.u32 %v4516_v34, %v3551_v35  ;;  %v3322_v46 = vor.u32 %v4523_v33, %v3319_v37 }
  0x29   : > { %v3559_v43 = vld [vmem:[%s6106_s10 + $0xf8] sm:$0xf0]  ;;  %v3558_v47 = vor.u32 %v4519_v39, %v3557_v38  ;;  %v3533_v49 = vld [vmem:[%s6106_s10 + $0xc0] sm:$0xf]  ;;  %v4514_v50 = vld [vmem:[%s6106_s10 + $0xcc] sm:$0xf0] }
  0x2a   : > { %962 = vmatpush.bf16.msrb.mxu0 %v3386_v56  ;;  %v3562_v48 = vor.u32 %v4517_v42, %v3559_v43  ;;  %v4512_v51 = vld [vmem:[%s6106_s10 + $0xc4] sm:$0xf]  ;;  %v3534_v52 = vor.u32 %v4514_v50, %v3533_v49  ;;  %v3535_v53 = vld [vmem:[%s6106_s10 + $0xd0] sm:$0xf0]  ;;  %v3541_v54 = vld [vmem:[%s6106_s10 + $0xc8] sm:$0xf] }
  0x2b   : > { %923 = vmatpush.bf16.msra.mxu2 %v3326_v20  ;;  %v4515_v55 = vld [vmem:[%s6106_s10 + $0xd4] sm:$0xf0]  ;;  %v3538_v56 = vor.u32 %v4512_v51, %v3535_v53  ;;  %v4513_v58 = vld [vmem:[%s6106_s10 + $0xcc] sm:$0xf]  ;;  %v3543_v59 = vld [vmem:[%s6106_s10 + $0xd8] sm:$0xf0] }
  0x2c   : > { %950 = vmatpush.bf16.msrb.mxu1 %v3350_v13  ;;  %937 = vmatpush.bf16.msra.mxu3 %v3330_v24  ;;  %v3542_v57 = vor.u32 %v4515_v55, %v3541_v54  ;;  %v3546_v60 = vor.u32 %v4513_v58, %v3543_v59  ;;  %v3517_v61 = vld [vmem:[%s6106_s10 + $0xa0] sm:$0xf]  ;;  %v4510_v62 = vld [vmem:[%s6106_s10 + $0xac] sm:$0xf0]  ;;  %v4508_v63 = vld [vmem:[%s6106_s10 + $0xa4] sm:$0xf] }
  0x2d   : > { %v3518_v0 = vor.u32 %v4510_v62, %v3517_v61  ;;  %v3519_v1 = vld [vmem:[%s6106_s10 + $0xb0] sm:$0xf0]  ;;  %v3525_v2 = vld [vmem:[%s6106_s10 + $0xa8] sm:$0xf]  ;;  %v4511_v3 = vld [vmem:[%s6106_s10 + $0xb4] sm:$0xf0] }
  0x2e   : > { %963 = vmatpush.bf16.msrb.mxu0 %v3370_v4  ;;  %v3522_v4 = vor.u32 %v4508_v63, %v3519_v1  ;;  %v3526_v5 = vor.u32 %v4511_v3, %v3525_v2  ;;  %v4509_v6 = vld [vmem:[%s6106_s10 + $0xac] sm:$0xf]  ;;  %v3527_v7 = vld [vmem:[%s6106_s10 + $0xb8] sm:$0xf0]  ;;  %v3501_v9 = vld [vmem:[%s6106_s10 + $0x80] sm:$0xf] }
  0x2f   : > { %924 = vmatpush.bf16.msra.mxu2 %v3310_v36  ;;  %v3530_v8 = vor.u32 %v4509_v6, %v3527_v7  ;;  %v4506_v10 = vld [vmem:[%s6106_s10 + $0x8c] sm:$0xf0]  ;;  %v4504_v11 = vld [vmem:[%s6106_s10 + $0x84] sm:$0xf]  ;;  %v3503_v13 = vld [vmem:[%s6106_s10 + $0x90] sm:$0xf0] }
  0x30   : > { %951 = vmatpush.bf16.msrb.mxu1 %v3334_v28  ;;  %938 = vmatpush.bf16.msra.mxu3 %v3314_v40  ;;  %v3502_v12 = vor.u32 %v4506_v10, %v3501_v9  ;;  %v3509_v14 = vld [vmem:[%s6106_s10 + $0x88] sm:$0xf]  ;;  %v4507_v15 = vld [vmem:[%s6106_s10 + $0x94] sm:$0xf0]  ;;  %v4505_v18 = vld [vmem:[%s6106_s10 + $0x8c] sm:$0xf] }
  0x31   : > { %v3510_v17 = vor.u32 %v4507_v15, %v3509_v14  ;;  %v3511_v19 = vld [vmem:[%s6106_s10 + $0x98] sm:$0xf0]  ;;  %v3485_v21 = vld [vmem:[%s6106_s10 + $0x60] sm:$0xf]  ;;  %v4502_v22 = vld [vmem:[%s6106_s10 + $0x6c] sm:$0xf0] }
  0x32   : > { %964 = vmatpush.bf16.msrb.mxu0 %v3354_v16  ;;  %v3506_v16 = vor.u32 %v4504_v11, %v3503_v13  ;;  %v3514_v20 = vor.u32 %v4505_v18, %v3511_v19  ;;  %v4500_v23 = vld [vmem:[%s6106_s10 + $0x64] sm:$0xf]  ;;  %v3486_v24 = vor.u32 %v4502_v22, %v3485_v21  ;;  %v3487_v25 = vld [vmem:[%s6106_s10 + $0x70] sm:$0xf0]  ;;  %v3493_v26 = vld [vmem:[%s6106_s10 + $0x68] sm:$0xf] }
  0x33   : > { %1133 = vmatpush.bf16.msrb.mxu2 %v3550_v41  ;;  %v4503_v27 = vld [vmem:[%s6106_s10 + $0x74] sm:$0xf0]  ;;  %v3490_v28 = vor.u32 %v4500_v23, %v3487_v25  ;;  %v4501_v30 = vld [vmem:[%s6106_s10 + $0x6c] sm:$0xf]  ;;  %v3495_v31 = vld [vmem:[%s6106_s10 + $0x78] sm:$0xf0] }
  0x34   : > { %952 = vmatpush.bf16.msrb.mxu1 %v3318_v44  ;;  %1147 = vmatpush.bf16.msrb.mxu3 %v3554_v45  ;;  %v3494_v29 = vor.u32 %v4503_v27, %v3493_v26  ;;  %v3469_v33 = vld [vmem:[%s6106_s10 + $0x40] sm:$0xf]  ;;  %v4498_v34 = vld [vmem:[%s6106_s10 + $0x4c] sm:$0xf0]  ;;  %v4496_v35 = vld [vmem:[%s6106_s10 + $0x44] sm:$0xf] }
  0x35   : > { %v3470_v36 = vor.u32 %v4498_v34, %v3469_v33  ;;  %v3471_v37 = vld [vmem:[%s6106_s10 + $0x50] sm:$0xf0]  ;;  %v3477_v38 = vld [vmem:[%s6106_s10 + $0x48] sm:$0xf]  ;;  %v4499_v39 = vld [vmem:[%s6106_s10 + $0x54] sm:$0xf0] }
  0x36   : > { %965 = vmatpush.bf16.msrb.mxu0 %v3338_v32  ;;  %v3498_v32 = vor.u32 %v4501_v30, %v3495_v31  ;;  %v3474_v40 = vor.u32 %v4496_v35, %v3471_v37  ;;  %v3478_v41 = vor.u32 %v4499_v39, %v3477_v38  ;;  %v4497_v42 = vld [vmem:[%s6106_s10 + $0x4c] sm:$0xf]  ;;  %v3479_v43 = vld [vmem:[%s6106_s10 + $0x58] sm:$0xf0]  ;;  %v3453_v44 = vld [vmem:[%s6106_s10 + $0x20] sm:$0xf] }
  0x37   : > { %1134 = vmatpush.bf16.msrb.mxu2 %v3534_v52  ;;  %v3482_v45 = vor.u32 %v4497_v42, %v3479_v43  ;;  %v3461_v51 = vld [vmem:[%s6106_s10 + $0x28] sm:$0xf]  ;;  %v4495_v52 = vld [vmem:[%s6106_s10 + $0x34] sm:$0xf0]  ;;  %v4493_v53 = vld [vmem:[%s6106_s10 + $0x2c] sm:$0xf] }
  0x38   : > { %1161 = vmatpush.bf16.msra.mxu1 %v3558_v47  ;;  %1148 = vmatpush.bf16.msrb.mxu3 %v3538_v56  ;;  %v4492_v47 = vld [vmem:[%s6106_s10 + $0x24] sm:$0xf]  ;;  %v3462_v54 = vor.u32 %v4495_v52, %v3461_v51  ;;  %v3463_v55 = vld [vmem:[%s6106_s10 + $0x38] sm:$0xf0]  ;;  %v3437_v56 = vld [vmem:[%s6106_s10] sm:$0xf] }
  0x39   : > { %v3466_v58 = vor.u32 %v4493_v53, %v3463_v55  ;;  %v4488_v59 = vld [vmem:[%s6106_s10 + $0x4] sm:$0xf]  ;;  %v3445_v61 = vld [vmem:[%s6106_s10 + $0x8] sm:$0xf]  ;;  %v4491_v63 = vld [vmem:[%s6106_s10 + $0x14] sm:$0xf0] }
  0x3a   : > { %966 = vmatpush.bf16.msrb.mxu0 %v3322_v46  ;;  %v4494_v46 = vld [vmem:[%s6106_s10 + $0x2c] sm:$0xf0]  ;;  %v3447_v1 = vld [vmem:[%s6106_s10 + $0x18] sm:$0xf0]  ;;  %v3446_v3 = vor.u32 %v4491_v63, %v3445_v61  ;;  %v1189_v6 = vld [vmem:[%s600_s24] sm:$0xf] }
  0x3b   : > { %1135 = vmatpush.bf16.msrb.mxu2 %v3518_v0  ;;  %v3454_v49 = vor.u32 %v4494_v46, %v3453_v44  ;;  %v4489_v0 = vld [vmem:[%s6106_s10 + $0xc] sm:$0xf]  ;;  %v1203_v9 = vsel %vm1201_vm2, %v1189_v6, 0  ;;  %v4554_v13 = vld [vmem:[%s6103_s7] sm:$0xff]  ;;  %v4585_v15 = vld [vmem:[%s6108_s12 + $0xec] sm:$0xf0] }
  0x3c   : > { %1162 = vmatpush.bf16.msra.mxu1 %v3542_v57  ;;  %1149 = vmatpush.bf16.msrb.mxu3 %v3522_v4  ;;  %v4490_v57 = vld [vmem:[%s6106_s10 + $0xc] sm:$0xf0]  ;;  %v3450_v4 = vor.u32 %v4489_v0, %v3447_v1  ;;  %v3682_v14 = vld [vmem:[%s6108_s12 + $0xe0] sm:$0xf]  ;;  %v3684_v18 = vld [vmem:[%s6108_s12 + $0xf0] sm:$0xf0] }
  0x3d   : > { %v3438_v62 = vor.u32 %v4490_v57, %v3437_v56  ;;  %v3690_v19 = vld [vmem:[%s6108_s12 + $0xe8] sm:$0xf]  ;;  %v4584_v23 = vld [vmem:[%s6108_s12 + $0xec] sm:$0xf]  ;;  %v3666_v26 = vld [vmem:[%s6108_s12 + $0xc0] sm:$0xf] }
  0x3e   : > { %1175 = vmatpush.bf16.msra.mxu0 %v3562_v48  ;;  %v3455_v48 = vld [vmem:[%s6106_s10 + $0x30] sm:$0xf0]  ;;  %v4581_v27 = vld [vmem:[%s6108_s12 + $0xcc] sm:$0xf0]  ;;  %v3674_v31 = vld [vmem:[%s6108_s12 + $0xc8] sm:$0xf] }
  0x3f   : > { %1136 = vmatpush.bf16.msrb.mxu2 %v3502_v12  ;;  %v3458_v50 = vor.u32 %v4492_v47, %v3455_v48  ;;  %v3668_v30 = vld [vmem:[%s6108_s12 + $0xd0] sm:$0xf0]  ;;  %v4580_v35 = vld [vmem:[%s6108_s12 + $0xcc] sm:$0xf]  ;;  %v3650_v38 = vld [vmem:[%s6108_s12 + $0xa0] sm:$0xf] }
  0x40   : > { %1163 = vmatpush.bf16.msra.mxu1 %v3526_v5  ;;  %1150 = vmatpush.bf16.msrb.mxu3 %v3506_v16  ;;  %v4583_v16 = vld [vmem:[%s6108_s12 + $0xe4] sm:$0xf]  ;;  %v4577_v39 = vld [vmem:[%s6108_s12 + $0xac] sm:$0xf0]  ;;  %v3652_v42 = vld [vmem:[%s6108_s12 + $0xb0] sm:$0xf0] }
  0x41   : > { %v3687_v21 = vor.u32 %v4583_v16, %v3684_v18  ;;  %v3658_v43 = vld [vmem:[%s6108_s12 + $0xa8] sm:$0xf]  ;;  %v4578_v44 = vld [vmem:[%s6108_s12 + $0xb4] sm:$0xf0]  ;;  %v4576_v47 = vld [vmem:[%s6108_s12 + $0xac] sm:$0xf] }
  0x42   : > { %1176 = vmatpush.bf16.msra.mxu0 %v3546_v60  ;;  %v3439_v60 = vld [vmem:[%s6106_s10 + $0x10] sm:$0xf0]  ;;  %v3659_v46 = vor.u32 %v4578_v44, %v3658_v43  ;;  %v3660_v48 = vld [vmem:[%s6108_s12 + $0xb8] sm:$0xf0]  ;;  %v4573_v51 = vld [vmem:[%s6108_s12 + $0x8c] sm:$0xf0] }
  0x43   : > { %1137 = vmatpush.bf16.msrb.mxu2 %v3486_v24  ;;  %v3442_v2 = vor.u32 %v4488_v59, %v3439_v60  ;;  %v3692_v24 = vld [vmem:[%s6108_s12 + $0xf8] sm:$0xf0]  ;;  %v4571_v52 = vld [vmem:[%s6108_s12 + $0x84] sm:$0xf]  ;;  %v3642_v55 = vld [vmem:[%s6108_s12 + $0x88] sm:$0xf] }
  0x44   : > { %1164 = vmatpush.bf16.msra.mxu1 %v3510_v17  ;;  %1151 = vmatpush.bf16.msrb.mxu3 %v3490_v28  ;;  %v3683_v17 = vor.u32 %v4585_v15, %v3682_v14  ;;  %v3695_v25 = vor.u32 %v4584_v23, %v3692_v24  ;;  %v4579_v28 = vld [vmem:[%s6108_s12 + $0xc4] sm:$0xf]  ;;  %v4574_v56 = vld [vmem:[%s6108_s12 + $0x94] sm:$0xf0]  ;;  %v4572_v59 = vld [vmem:[%s6108_s12 + $0x8c] sm:$0xf] }
  0x45   : > { %v3671_v33 = vor.u32 %v4579_v28, %v3668_v30  ;;  %v3644_v60 = vld [vmem:[%s6108_s12 + $0x98] sm:$0xf0]  ;;  %v4569_v63 = vld [vmem:[%s6108_s12 + $0x6c] sm:$0xf0]  ;;  %v4567_v0 = vld [vmem:[%s6108_s12 + $0x64] sm:$0xf] }
  0x46   : > { %1177 = vmatpush.bf16.msra.mxu0 %v3530_v8  ;;  %v3647_v61 = vor.u32 %v4572_v59, %v3644_v60  ;;  %v4563_v14 = vld [vmem:[%s6108_s12 + $0x44] sm:$0xf]  ;;  %v3604_v16 = vld [vmem:[%s6108_s12 + $0x50] sm:$0xf0]  ;;  %v4566_v18 = vld [vmem:[%s6108_s12 + $0x54] sm:$0xf0] }
  0x47   : > { %1138 = vmatpush.bf16.msrb.mxu2 %v3470_v36  ;;  %v3676_v36 = vld [vmem:[%s6108_s12 + $0xd8] sm:$0xf0]  ;;  %v4564_v23 = vld [vmem:[%s6108_s12 + $0x4c] sm:$0xf]  ;;  %v4559_v28 = vld [vmem:[%s6108_s12 + $0x24] sm:$0xf] }
  0x48   : > { %1165 = vmatpush.bf16.msra.mxu1 %v3494_v29  ;;  %1152 = vmatpush.bf16.msrb.mxu3 %v3474_v40  ;;  %v3667_v29 = vor.u32 %v4581_v27, %v3666_v26  ;;  %v3679_v37 = vor.u32 %v4580_v35, %v3676_v36  ;;  %v4575_v40 = vld [vmem:[%s6108_s12 + $0xa4] sm:$0xf]  ;;  %v3612_v24 = vld [vmem:[%s6108_s12 + $0x58] sm:$0xf0]  ;;  %v4561_v27 = vld [vmem:[%s6108_s12 + $0x2c] sm:$0xf0] }
  0x49   : > { %v3615_v26 = vor.u32 %v4564_v23, %v3612_v24  ;;  %v3572_v44 = vld [vmem:[%s6108_s12 + $0x10] sm:$0xf0]  ;;  %v3896_v23 = vld [vmem:[%s6109_s13 + $0x180] sm:$0xf]  ;;  %v4638_v24 = vld [vmem:[%s6109_s13 + $0x18c] sm:$0xf0] }
  0x4a   : > { %1178 = vmatpush.bf16.msra.mxu0 %v3514_v20  ;;  %v4586_v20 = vld [vmem:[%s6108_s12 + $0xf4] sm:$0xf0] }
  0x4b   : > { %1139 = vmatpush.bf16.msrb.mxu2 %v3454_v49  ;;  %v3691_v22 = vor.u32 %v4586_v20, %v3690_v19  ;;  %v3663_v49 = vor.u32 %v4576_v47, %v3660_v48 }
  0x4c   : > { %1166 = vmatpush.bf16.msra.mxu1 %v3478_v41  ;;  %1153 = vmatpush.bf16.msrb.mxu3 %v3458_v50  ;;  %v3651_v41 = vor.u32 %v4577_v39, %v3650_v38  ;;  %v3634_v50 = vld [vmem:[%s6108_s12 + $0x80] sm:$0xf]  ;;  %v3596_v38 = vld [vmem:[%s6108_s12 + $0x38] sm:$0xf0] }
  0x4d   : > { %v3635_v53 = vor.u32 %v4573_v51, %v3634_v50  ;;  %v4556_v51 = vld [vmem:[%s6108_s12 + $0xc] sm:$0xf] }
  0x4e   : > { %1179 = vmatpush.bf16.msra.mxu0 %v3498_v32  ;;  %v4582_v32 = vld [vmem:[%s6108_s12 + $0xd4] sm:$0xf0] }
  0x4f   : > { %1140 = vmatpush.bf16.msrb.mxu2 %v3438_v62  ;;  %v3675_v34 = vor.u32 %v4582_v32, %v3674_v31  ;;  %v3618_v62 = vld [vmem:[%s6108_s12 + $0x60] sm:$0xf]  ;;  %v3594_v32 = vld [vmem:[%s6108_s12 + $0x28] sm:$0xf] }
  0x50   : > { %1167 = vmatpush.bf16.msra.mxu1 %v3462_v54  ;;  %1154 = vmatpush.bf16.msrb.mxu3 %v3442_v2  ;;  %v3636_v54 = vld [vmem:[%s6108_s12 + $0x90] sm:$0xf0]  ;;  %v3619_v1 = vor.u32 %v4569_v63, %v3618_v62 }
  0x51   : > { %v3639_v57 = vor.u32 %v4571_v52, %v3636_v54  ;;  %v3620_v2 = vld [vmem:[%s6108_s12 + $0x70] sm:$0xf0]  ;;  %v3580_v52 = vld [vmem:[%s6108_s12 + $0x18] sm:$0xf0] }
  0x52   : > { %1180 = vmatpush.bf16.msra.mxu0 %v3482_v45  ;;  %v3655_v45 = vor.u32 %v4575_v40, %v3652_v42  ;;  %v3570_v40 = vld [vmem:[%s6108_s12] sm:$0xf]  ;;  %v4555_v42 = vld [vmem:[%s6108_s12 + $0x4] sm:$0xf]  ;;  %v3583_v54 = vor.u32 %v4556_v51, %v3580_v52  ;;  %v3786_v52 = vld [vmem:[%s6109_s13 + $0xb0] sm:$0xf0] }
  0x53   : > { %v4608_v51 = vld [vmem:[%s6109_s13 + $0xa4] sm:$0xf] }
  0x54   : > { %1168 = vmatpush.bf16.msra.mxu1 %v3446_v3  ;;  %v3626_v3 = vld [vmem:[%s6108_s12 + $0x68] sm:$0xf] }
  0x56   : > { %1181 = vmatpush.bf16.msra.mxu0 %v3466_v58  ;;  %v3643_v58 = vor.u32 %v4574_v56, %v3642_v55 }
  0x5a   : > { %1182 = vmatpush.bf16.msra.mxu0 %v3450_v4  ;;  %v4570_v4 = vld [vmem:[%s6108_s12 + $0x74] sm:$0xf0] }
  0x94   : > { %v719_v5 = vpop.f32.mrf.mxu1 }
  0x9a   : > { %v653_v10 = vpop.f32.mrf.mxu0 }
  0x9c   : > { %v721_v7 = vpop.f32.mrf.mxu1 }
  0x9d   : > { %v724_v8 = vpack.c.bf16 %v721_v7, %v719_v5  ;;  %v3623_v7 = vor.u32 %v4567_v0, %v3620_v2 }
  0x9f   : > { %925 = vmatmul.bf16.vlgmr.msra.gmra.mxu2 %v724_v8  ;;  %939 = vmatmul.bf16.vlgmr.msra.gmra.mxu3 %v724_v8 }
  0xa0   : > { %953 = vmatmul.bf16.vlgmr.msrb.gmra.mxu1 %v724_v8  ;;  %967 = vmatmul.bf16.vlgmr.msrb.gmra.mxu0 %v724_v8  ;;  %v3627_v8 = vor.u32 %v4570_v4, %v3626_v3 }
  0xa1   : > { %1212 = vmatpush.bf16.msra.mxu2 %v1203_v9  ;;  %1412 = vmatpush.bf16.msra.mxu3 %v3683_v17  ;;  %v4568_v9 = vld [vmem:[%s6108_s12 + $0x6c] sm:$0xf]  ;;  %v3610_v17 = vld [vmem:[%s6108_s12 + $0x48] sm:$0xf] }
  0xa2   : > { %v655_v11 = vpop.f32.mrf.mxu0  ;;  %1426 = vmatpush.bf16.msrb.mxu1 %v3687_v21  ;;  %1440 = vmatpush.bf16.msrb.mxu0 %v3691_v22  ;;  %v3607_v21 = vor.u32 %v4563_v14, %v3604_v16  ;;  %v3611_v22 = vor.u32 %v4566_v18, %v3610_v17  ;;  %v4618_v14 = vld [vmem:[%s6109_s13 + $0xec] sm:$0xf0]  ;;  %v3912_v16 = vld [vmem:[%s6109_s13 + $0x1a0] sm:$0xf] }
  0xa3   : > { %v658_v12 = vpack.c.bf16 %v655_v11, %v653_v10  ;;  %v3628_v10 = vld [vmem:[%s6108_s12 + $0x78] sm:$0xf0]  ;;  %v4642_v17 = vld [vmem:[%s6109_s13 + $0x1ac] sm:$0xf0] }
  0xa4   : > { %v3631_v11 = vor.u32 %v4568_v9, %v3628_v10  ;;  %v3928_v10 = vld [vmem:[%s6109_s13 + $0x1c0] sm:$0xf] }
  0xa5   : > { %1413 = vmatpush.bf16.msra.mxu3 %v3667_v29  ;;  %v3588_v29 = vld [vmem:[%s6108_s12 + $0x30] sm:$0xf0] }
  0xa6   : > { %1427 = vmatpush.bf16.msrb.mxu1 %v3671_v33  ;;  %1441 = vmatpush.bf16.msrb.mxu0 %v3675_v34  ;;  %v3591_v31 = vor.u32 %v4559_v28, %v3588_v29  ;;  %v4562_v33 = vld [vmem:[%s6108_s12 + $0x34] sm:$0xf0]  ;;  %v4560_v34 = vld [vmem:[%s6108_s12 + $0x2c] sm:$0xf]  ;;  %v3946_v29 = vld [vmem:[%s6109_s13 + $0x1f0] sm:$0xf0] }
  0xa7   : > { %v3599_v39 = vor.u32 %v4560_v34, %v3596_v38  ;;  %v4634_v34 = vld [vmem:[%s6109_s13 + $0x16c] sm:$0xf0] }
  0xa9   : > { %1414 = vmatpush.bf16.msra.mxu3 %v3651_v41  ;;  %v4557_v41 = vld [vmem:[%s6108_s12 + $0xc] sm:$0xf0] }
  0xaa   : > { %1428 = vmatpush.bf16.msrb.mxu1 %v3655_v45  ;;  %1442 = vmatpush.bf16.msrb.mxu0 %v3659_v46  ;;  %v3571_v43 = vor.u32 %v4557_v41, %v3570_v40  ;;  %v3578_v45 = vld [vmem:[%s6108_s12 + $0x8] sm:$0xf]  ;;  %v4558_v46 = vld [vmem:[%s6108_s12 + $0x14] sm:$0xf0]  ;;  %v4644_v40 = vld [vmem:[%s6109_s13 + $0x1c4] sm:$0xf] }
  0xab   : > { %v3579_v50 = vor.u32 %v4558_v46, %v3578_v45 }
  0xad   : > { %1415 = vmatpush.bf16.msra.mxu3 %v3635_v53  ;;  %v1476_v53 = vld [vmem:[%s605_s18] sm:$0xff]  ;;  %s4484_s18 = sshll.u32 %s6116_s25, 6 }
  0xae   : > { %1429 = vmatpush.bf16.msrb.mxu1 %v3639_v57  ;;  %1443 = vmatpush.bf16.msrb.mxu0 %v3643_v58  ;;  %v1485_v59 = vunpack.c.l.b16 %v1476_v53  ;;  %v1486_v60 = vunpack.c.h.b16 %v1476_v53  ;;  %s6073_s29 = scalar_lea.vmem %s6112_s16, %s4484_s18 }
  0xaf   : > { %1141 = vmatmul.bf16.vlgmr.msrb.gmra.mxu2 %v658_v12  ;;  %1155 = vmatmul.bf16.vlgmr.msrb.gmra.mxu3 %v658_v12 }
  0xb0   : > { %1169 = vmatmul.bf16.vlgmr.msra.gmra.mxu1 %v658_v12  ;;  %1183 = vmatmul.bf16.vlgmr.msra.gmra.mxu0 %v658_v12  ;;  %v3602_v12 = vld [vmem:[%s6108_s12 + $0x40] sm:$0xf]  ;;  %v1488_v62 = vpack.c.b16 %v1486_v60, %v1486_v60  ;;  %v4632_v60 = vld [vmem:[%s6109_s13 + $0x164] sm:$0xf] }
  0xb1   : > { %1454 = vmatpush.bf16.msrb.mxu2 %v3695_v25  ;;  %1416 = vmatpush.bf16.msra.mxu3 %v3619_v1  ;;  %v3586_v25 = vld [vmem:[%s6108_s12 + $0x20] sm:$0xf] }
  0xb2   : > { %1430 = vmatpush.bf16.msrb.mxu1 %v3623_v7  ;;  %1444 = vmatpush.bf16.msrb.mxu0 %v3627_v8  ;;  %v3587_v30 = vor.u32 %v4561_v27, %v3586_v25  ;;  %v1496_v2 = vsel %vm1201_vm2, %v1488_v62, 0  ;;  %v4650_v8 = vld [vmem:[%s6109_s13 + $0x1ec] sm:$0xf0]  ;;  %v3784_v25 = vld [vmem:[%s6109_s13 + $0xa0] sm:$0xf] }
  0xb3   : > { %v4648_v27 = vld [vmem:[%s6109_s13 + $0x1e4] sm:$0xf] }
  0xb4   : > { %v4587_v62 = vld [vmem:[%s6104_s8] sm:$0xff] }
  0xb5   : > { %1455 = vmatpush.bf16.msrb.mxu2 %v3679_v37  ;;  %v3595_v37 = vor.u32 %v4562_v33, %v3594_v32  ;;  %v3897_v32 = vor.u32 %v4638_v24, %v3896_v23  ;;  %v3880_v33 = vld [vmem:[%s6109_s13 + $0x160] sm:$0xf]  ;;  %v4624_v23 = vld [vmem:[%s6109_s13 + $0x124] sm:$0xf] }
  0xb6   : > { %1431 = vmatpush.bf16.msrb.mxu1 %v3607_v21  ;;  %1445 = vmatpush.bf16.msrb.mxu0 %v3611_v22  ;;  %v3913_v22 = vor.u32 %v4642_v17, %v3912_v16  ;;  %v3881_v45 = vor.u32 %v4634_v34, %v3880_v33  ;;  %v3832_v33 = vld [vmem:[%s6109_s13 + $0x100] sm:$0xf]  ;;  %v4622_v34 = vld [vmem:[%s6109_s13 + $0x10c] sm:$0xf0] }
  0xb9   : > { %1456 = vmatpush.bf16.msrb.mxu2 %v3663_v49  ;;  %v3575_v49 = vor.u32 %v4555_v42, %v3572_v44  ;;  %v3930_v42 = vld [vmem:[%s6109_s13 + $0x1d0] sm:$0xf0] }
  0xba   : > { %1432 = vmatpush.bf16.msrb.mxu1 %v3591_v31  ;;  %1446 = vmatpush.bf16.msrb.mxu0 %v3595_v37  ;;  %v3818_v31 = vld [vmem:[%s6109_s13 + $0xf0] sm:$0xf0]  ;;  %v3933_v46 = vor.u32 %v4644_v40, %v3930_v42  ;;  %v3952_v40 = vld [vmem:[%s6109_s13 + $0x1e8] sm:$0xf] }
  0xbb   : > { %v3802_v44 = vld [vmem:[%s6109_s13 + $0xd0] sm:$0xf0] }
  0xbd   : > { %1457 = vmatpush.bf16.msrb.mxu2 %v3647_v61  ;;  %v1487_v61 = vpack.c.b16 %v1485_v59, %v1485_v59 }
  0xbe   : > { %1433 = vmatpush.bf16.msrb.mxu1 %v3575_v49  ;;  %1447 = vmatpush.bf16.msrb.mxu0 %v3579_v50  ;;  %v3914_v50 = vld [vmem:[%s6109_s13 + $0x1b0] sm:$0xf0] }
  0xbf   : > { %3567 = vmatmul.msk.bf16.vlgmr.msra.gmra.mxu2 %vm1197_vm3, %v4554_v13  ;;  %v4565_v13 = vld [vmem:[%s6108_s12 + $0x4c] sm:$0xf0]  ;;  %v1493_v1 = vsel %vm1201_vm2, %v1487_v61, 0  ;;  %v3882_v61 = vld [vmem:[%s6109_s13 + $0x170] sm:$0xf0] }
  0xc0   : > { %v3603_v15 = vor.u32 %v4565_v13, %v3602_v12  ;;  %v3816_v12 = vld [vmem:[%s6109_s13 + $0xe0] sm:$0xf] }
  0xc1   : > { %1458 = vmatpush.bf16.msrb.mxu2 %v3631_v11  ;;  %v4646_v11 = vld [vmem:[%s6109_s13 + $0x1cc] sm:$0xf0] }
  0xc2   : > { %1417 = vmatpush.bf16.msra.mxu3 %v3603_v15  ;;  %1519 = vmatpush.bf16.msra.mxu1 %v1496_v2  ;;  %v3929_v13 = vor.u32 %v4646_v11, %v3928_v10  ;;  %v3817_v15 = vor.u32 %v4618_v14, %v3816_v12  ;;  %v4604_v2 = vld [vmem:[%s6109_s13 + $0x84] sm:$0xf]  ;;  %v4630_v10 = vld [vmem:[%s6109_s13 + $0x14c] sm:$0xf0]  ;;  %v3752_v14 = vld [vmem:[%s6109_s13 + $0x60] sm:$0xf] }
  0xc3   : > { %v4628_v11 = vld [vmem:[%s6109_s13 + $0x144] sm:$0xf] }
  0xc4   : > { %1912 = vmatpush.bf16.msra.mxu0 %v3817_v15  ;;  %v4602_v15 = vld [vmem:[%s6109_s13 + $0x6c] sm:$0xf0] }
  0xc5   : > { %1459 = vmatpush.bf16.msrb.mxu2 %v3615_v26  ;;  %v4610_v26 = vld [vmem:[%s6109_s13 + $0xac] sm:$0xf0]  ;;  %v3753_v17 = vor.u32 %v4602_v15, %v3752_v14  ;;  %v4643_v14 = vld [vmem:[%s6109_s13 + $0x1b4] sm:$0xf0]  ;;  %v4641_v15 = vld [vmem:[%s6109_s13 + $0x1ac] sm:$0xf] }
  0xc6   : > { %1418 = vmatpush.bf16.msra.mxu3 %v3587_v30  ;;  %v3785_v28 = vor.u32 %v4610_v26, %v3784_v25  ;;  %v4616_v30 = vld [vmem:[%s6109_s13 + $0xe4] sm:$0xf]  ;;  %v3850_v25 = vld [vmem:[%s6109_s13 + $0x130] sm:$0xf0] }
  0xc7   : > { %v3821_v41 = vor.u32 %v4616_v30, %v3818_v31  ;;  %v3853_v26 = vor.u32 %v4624_v23, %v3850_v25  ;;  %v3738_v31 = vld [vmem:[%s6109_s13 + $0x50] sm:$0xf0]  ;;  %v3810_v23 = vld [vmem:[%s6109_s13 + $0xd8] sm:$0xf0]  ;;  %v3904_v25 = vld [vmem:[%s6109_s13 + $0x188] sm:$0xf] }
  0xc9   : > { %1460 = vmatpush.bf16.msrb.mxu2 %v3599_v39  ;;  %v3949_v39 = vor.u32 %v4648_v27, %v3946_v29  ;;  %v3736_v27 = vld [vmem:[%s6109_s13 + $0x40] sm:$0xf]  ;;  %v4596_v29 = vld [vmem:[%s6109_s13 + $0x44] sm:$0xf] }
  0xca   : > { %1419 = vmatpush.bf16.msra.mxu3 %v3571_v43  ;;  %v4612_v43 = vld [vmem:[%s6109_s13 + $0xc4] sm:$0xf] }
  0xcb   : > { %v3805_v49 = vor.u32 %v4612_v43, %v3802_v44  ;;  %v4649_v44 = vld [vmem:[%s6109_s13 + $0x1ec] sm:$0xf] }
  0xcd   : > { %1461 = vmatpush.bf16.msrb.mxu2 %v3583_v54  ;;  %v3789_v54 = vor.u32 %v4608_v51, %v3786_v52  ;;  %v3722_v51 = vld [vmem:[%s6109_s13 + $0x30] sm:$0xf0] }
  0xce   : > { %1505 = vmatpush.bf16.msrb.mxu3 %v1493_v1  ;;  %v4606_v1 = vld [vmem:[%s6109_s13 + $0x8c] sm:$0xf0] }
 0x11d   : > { %v5472_v5 = vpop.f32.mrf.mxu1  ;;  %v5474_v6 = vpop.f32.mrf.mxu0 }
 0x122   : > { %v926_v19 = vpop.f32.mrf.mxu2  ;;  %v940_v20 = vpop.f32.mrf.mxu3 }
 0x125   : > { %v5527_v35 = vpop.f32.mrf.mxu1  ;;  %v5529_v36 = vpop.f32.mrf.mxu0 }
 0x12a   : > { %v928_v47 = vpop.f32.mrf.mxu2  ;;  %v5557_v48 = vpop.f32.mrf.mxu3 }
 0x12d   : > { %v1170_v55 = vpop.f32.mrf.mxu1  ;;  %v1184_v56 = vpop.f32.mrf.mxu0 }
 0x12e   : > { %v5566_v57 = vadd.f32 %v1170_v55, %v5472_v5  ;;  %v5569_v58 = vadd.f32 %v1184_v56, %v5474_v6  ;;  %v3944_v6 = vld [vmem:[%s6109_s13 + $0x1e0] sm:$0xf]  ;;  %v4636_v55 = vld [vmem:[%s6109_s13 + $0x184] sm:$0xf]  ;;  %v3898_v56 = vld [vmem:[%s6109_s13 + $0x190] sm:$0xf0] }
 0x12f   : > { %v3945_v9 = vor.u32 %v4650_v8, %v3944_v6  ;;  %v3901_v59 = vor.u32 %v4636_v55, %v3898_v56  ;;  %v3770_v6 = vld [vmem:[%s6109_s13 + $0x90] sm:$0xf0]  ;;  %v4647_v55 = vld [vmem:[%s6109_s13 + $0x1d4] sm:$0xf0]  ;;  %v4645_v56 = vld [vmem:[%s6109_s13 + $0x1cc] sm:$0xf] }
 0x130   : > { %v3773_v8 = vor.u32 %v4604_v2, %v3770_v6  ;;  %v3706_v2 = vld [vmem:[%s6109_s13 + $0x10] sm:$0xf0] }
 0x131   : > { %1926 = vmatpush.bf16.msra.mxu2 %v3945_v9  ;;  %v3864_v9 = vld [vmem:[%s6109_s13 + $0x140] sm:$0xf] }
 0x132   : > { %v1142_v63 = vpop.f32.mrf.mxu2  ;;  %v1156_v0 = vpop.f32.mrf.mxu3  ;;  %v3865_v12 = vor.u32 %v4630_v10, %v3864_v9  ;;  %v4617_v9 = vld [vmem:[%s6109_s13 + $0xec] sm:$0xf]  ;;  %v3826_v10 = vld [vmem:[%s6109_s13 + $0xf8] sm:$0xf0] }
 0x133   : > { %v5573_v3 = vadd.f32 %v1142_v63, %v926_v19  ;;  %v5575_v4 = vadd.f32 %v1156_v0, %v940_v20  ;;  %v3800_v19 = vld [vmem:[%s6109_s13 + $0xc0] sm:$0xf]  ;;  %v4614_v20 = vld [vmem:[%s6109_s13 + $0xcc] sm:$0xf0]  ;;  %v3885_v63 = vor.u32 %v4632_v60, %v3882_v61  ;;  %v3938_v60 = vld [vmem:[%s6109_s13 + $0x1d8] sm:$0xf0] }
 0x134   : > { %v3801_v21 = vor.u32 %v4614_v20, %v3800_v19  ;;  %v3768_v0 = vld [vmem:[%s6109_s13 + $0x80] sm:$0xf]  ;;  %v3754_v19 = vld [vmem:[%s6109_s13 + $0x70] sm:$0xf0] }
 0x135   : > { %1927 = vmatpush.bf16.msra.mxu2 %v3929_v13  ;;  %v3866_v13 = vld [vmem:[%s6109_s13 + $0x150] sm:$0xf0]  ;;  %v3704_v61 = vld [vmem:[%s6109_s13] sm:$0xf] }
 0x136   : > { %1913 = vmatpush.bf16.msra.mxu0 %v3801_v21  ;;  %v3869_v16 = vor.u32 %v4628_v11, %v3866_v13  ;;  %v3848_v21 = vld [vmem:[%s6109_s13 + $0x120] sm:$0xf]  ;;  %v3920_v13 = vld [vmem:[%s6109_s13 + $0x1a8] sm:$0xf] }
 0x139   : > { %1928 = vmatpush.bf16.msra.mxu2 %v3913_v22  ;;  %v4626_v22 = vld [vmem:[%s6109_s13 + $0x12c] sm:$0xf0] }
 0x13a   : > { %v1144_v5 = vpop.f32.mrf.mxu2  ;;  %1914 = vmatpush.bf16.msra.mxu0 %v3785_v28  ;;  %v3849_v24 = vor.u32 %v4626_v22, %v3848_v21  ;;  %v4598_v28 = vld [vmem:[%s6109_s13 + $0x4c] sm:$0xf0]  ;;  %v4613_v21 = vld [vmem:[%s6109_s13 + $0xcc] sm:$0xf] }
 0x13b   : > { %v5577_v7 = vadd.f32 %v1144_v5, %v928_v47  ;;  %v4640_v47 = vld [vmem:[%s6109_s13 + $0x1a4] sm:$0xf]  ;;  %v3769_v5 = vor.u32 %v4606_v1, %v3768_v0  ;;  %v3737_v30 = vor.u32 %v4598_v28, %v3736_v27  ;;  %v4637_v27 = vld [vmem:[%s6109_s13 + $0x18c] sm:$0xf] }
 0x13c   : > { %v3917_v53 = vor.u32 %v4640_v47, %v3914_v50  ;;  %v4592_v50 = vld [vmem:[%s6109_s13 + $0x24] sm:$0xf] }
 0x13d   : > { %1929 = vmatpush.bf16.msra.mxu2 %v3897_v32  ;;  %v3741_v32 = vor.u32 %v4596_v29, %v3738_v31  ;;  %v4588_v1 = vld [vmem:[%s6109_s13 + $0x4] sm:$0xf]  ;;  %v3906_v29 = vld [vmem:[%s6109_s13 + $0x198] sm:$0xf0] }
 0x13e   : > { %1915 = vmatpush.bf16.msra.mxu0 %v3769_v5  ;;  %v3824_v5 = vld [vmem:[%s6109_s13 + $0xe8] sm:$0xf]  ;;  %v3709_v6 = vor.u32 %v4588_v1, %v3706_v2  ;;  %v3909_v31 = vor.u32 %v4637_v27, %v3906_v29  ;;  %v4603_v1 = vld [vmem:[%s6109_s13 + $0x74] sm:$0xf0]  ;;  %v4601_v2 = vld [vmem:[%s6109_s13 + $0x6c] sm:$0xf] }
 0x13f   : > { %v3728_v27 = vld [vmem:[%s6109_s13 + $0x28] sm:$0xf] }
 0x141   : > { %1930 = vmatpush.bf16.msra.mxu2 %v3881_v45  ;;  %v3954_v45 = vld [vmem:[%s6109_s13 + $0x1f8] sm:$0xf0] }
 0x142   : > { %v1214_v18 = vpop.f32.mrf.mxu2  ;;  %1916 = vmatpush.bf16.msra.mxu0 %v3753_v17  ;;  %v3957_v47 = vor.u32 %v4649_v44, %v3954_v45  ;;  %v3922_v17 = vld [vmem:[%s6109_s13 + $0x1b8] sm:$0xf0] }
 0x143   : > { %v3890_v45 = vld [vmem:[%s6109_s13 + $0x178] sm:$0xf0] }
 0x145   : > { %1931 = vmatpush.bf16.msra.mxu2 %v3865_v12  ;;  %v3829_v12 = vor.u32 %v4617_v9, %v3826_v10  ;;  %v3762_v9 = vld [vmem:[%s6109_s13 + $0x78] sm:$0xf0]  ;;  %v3856_v10 = vld [vmem:[%s6109_s13 + $0x128] sm:$0xf] }
 0x146   : > { %1917 = vmatpush.bf16.msra.mxu0 %v3737_v30  ;;  %v5848_v30 = vpop.f32.mrf.mxu1 }
 0x149   : > { %1932 = vmatpush.bf16.msra.mxu2 %v3849_v24  ;;  %v3813_v24 = vor.u32 %v4613_v21, %v3810_v23  ;;  %v4623_v23 = vld [vmem:[%s6109_s13 + $0x114] sm:$0xf0] }
 0x14a   : > { %v1216_v37 = vpop.f32.mrf.mxu2 }
 0x14b   : > { %v1219_v38 = vpack.c.bf16 %v1216_v37, %v1214_v18  ;;  %v4600_v18 = vld [vmem:[%s6109_s13 + $0x64] sm:$0xf] }
 0x14c   : > { %v3757_v20 = vor.u32 %v4600_v18, %v3754_v19  ;;  %v4620_v37 = vld [vmem:[%s6109_s13 + $0x104] sm:$0xf]  ;;  %v3925_v18 = vor.u32 %v4641_v15, %v3922_v17  ;;  %v3808_v19 = vld [vmem:[%s6109_s13 + $0xc8] sm:$0xf]  ;;  %v3858_v15 = vld [vmem:[%s6109_s13 + $0x138] sm:$0xf0] }
 0x14d   : > { %1420 = vmatmul.bf16.vlgmr.msra.gmra.mxu3 %v1219_v38  ;;  %1434 = vmatmul.bf16.vlgmr.msrb.gmra.mxu1 %v1219_v38 }
 0x14e   : > { %1448 = vmatmul.bf16.vlgmr.msrb.gmra.mxu0 %v1219_v38  ;;  %1462 = vmatmul.bf16.vlgmr.msrb.gmra.mxu2 %v1219_v38  ;;  %v3833_v38 = vor.u32 %v4622_v34, %v3832_v33  ;;  %v4611_v33 = vld [vmem:[%s6109_s13 + $0xb4] sm:$0xf0]  ;;  %v4609_v34 = vld [vmem:[%s6109_s13 + $0xac] sm:$0xf] }
 0x14f   : > { %1954 = vmatpush.bf16.msrb.mxu1 %v3949_v39  ;;  %1940 = vmatpush.bf16.msra.mxu3 %v3821_v41  ;;  %v3834_v39 = vld [vmem:[%s6109_s13 + $0x110] sm:$0xf0]  ;;  %v4651_v41 = vld [vmem:[%s6109_s13 + $0x1f4] sm:$0xf0] }
 0x150   : > { %v3837_v42 = vor.u32 %v4620_v37, %v3834_v39  ;;  %v3953_v43 = vor.u32 %v4651_v41, %v3952_v40  ;;  %1933 = vmatpush.bf16.msra.mxu2 %v3833_v38  ;;  %v5859_v37 = vpop.f32.mrf.mxu0  ;;  %v3794_v39 = vld [vmem:[%s6109_s13 + $0xb8] sm:$0xf0]  ;;  %v3888_v41 = vld [vmem:[%s6109_s13 + $0x168] sm:$0xf] }
 0x151   : > { %v3797_v40 = vor.u32 %v4609_v34, %v3794_v39 }
 0x153   : > { %1955 = vmatpush.bf16.msrb.mxu1 %v3933_v46  ;;  %1941 = vmatpush.bf16.msra.mxu3 %v3805_v49  ;;  %v3720_v46 = vld [vmem:[%s6109_s13 + $0x20] sm:$0xf]  ;;  %v4594_v49 = vld [vmem:[%s6109_s13 + $0x2c] sm:$0xf0] }
 0x154   : > { %1982 = vmatpush.bf16.msrb.mxu2 %v3953_v43  ;;  %v3721_v52 = vor.u32 %v4594_v49, %v3720_v46  ;;  %v4633_v43 = vld [vmem:[%s6109_s13 + $0x16c] sm:$0xf]  ;;  %v4607_v49 = vld [vmem:[%s6109_s13 + $0x94] sm:$0xf0] }
 0x155   : > { %v3893_v46 = vor.u32 %v4633_v43, %v3890_v45 }
 0x156   : > { %1918 = vmatpush.bf16.msra.mxu0 %v3721_v52  ;;  %v3778_v52 = vld [vmem:[%s6109_s13 + $0x98] sm:$0xf0] }
 0x157   : > { %1956 = vmatpush.bf16.msrb.mxu1 %v3917_v53  ;;  %1942 = vmatpush.bf16.msra.mxu3 %v3789_v54  ;;  %v3725_v53 = vor.u32 %v4592_v50, %v3722_v51  ;;  %v3936_v54 = vld [vmem:[%s6109_s13 + $0x1c8] sm:$0xf]  ;;  %v4605_v50 = vld [vmem:[%s6109_s13 + $0x8c] sm:$0xf] }
 0x15b   : > { %1957 = vmatpush.bf16.msrb.mxu1 %v3901_v59  ;;  %1943 = vmatpush.bf16.msra.mxu3 %v3773_v8  ;;  %v3937_v59 = vor.u32 %v4647_v55, %v3936_v54  ;;  %v4619_v8 = vld [vmem:[%s6109_s13 + $0xf4] sm:$0xf0]  ;;  %v3781_v54 = vor.u32 %v4605_v50, %v3778_v52  ;;  %v3872_v55 = vld [vmem:[%s6109_s13 + $0x148] sm:$0xf]  ;;  %v2032_v52 = vld [vmem:[%s610_s22] sm:$0xff] }
 0x15c   : > { %v3825_v11 = vor.u32 %v4619_v8, %v3824_v5 }
 0x15d   : > { %3700 = vmatmul.msk.bf16.vlgmr.msrb.gmra.mxu3 %vm1197_vm3, %v4587_v62  ;;  %3701 = vmatmul.msk.bf16.vlgmr.msra.gmra.mxu1 %vm1197_vm3, %v4587_v62  ;;  %v4590_v62 = vld [vmem:[%s6109_s13 + $0xc] sm:$0xf0] }
 0x15e   : > { %v3705_v0 = vor.u32 %v4590_v62, %v3704_v61  ;;  %1983 = vmatpush.bf16.msrb.mxu2 %v3937_v59  ;;  %v4629_v59 = vld [vmem:[%s6109_s13 + $0x14c] sm:$0xf]  ;;  %v3874_v61 = vld [vmem:[%s6109_s13 + $0x158] sm:$0xf0] }
 0x15f   : > { %1958 = vmatpush.bf16.msrb.mxu1 %v3885_v63  ;;  %1944 = vmatpush.bf16.msra.mxu3 %v3757_v20  ;;  %v3941_v63 = vor.u32 %v4645_v56, %v3938_v60  ;;  %v4615_v20 = vld [vmem:[%s6109_s13 + $0xd4] sm:$0xf0] }
 0x160   : > { %1919 = vmatpush.bf16.msra.mxu0 %v3705_v0  ;;  %v3809_v22 = vor.u32 %v4615_v20, %v3808_v19  ;;  %v4631_v56 = vld [vmem:[%s6109_s13 + $0x154] sm:$0xf0]  ;;  %v3760_v0 = vld [vmem:[%s6109_s13 + $0x68] sm:$0xf]  ;;  %v3746_v19 = vld [vmem:[%s6109_s13 + $0x58] sm:$0xf0] }
 0x161   : > { %v3873_v60 = vor.u32 %v4631_v56, %v3872_v55  ;;  %v3761_v8 = vor.u32 %v4603_v1, %v3760_v0 }
 0x163   : > { %1959 = vmatpush.bf16.msrb.mxu1 %v3869_v16  ;;  %1945 = vmatpush.bf16.msra.mxu3 %v3741_v32  ;;  %v3921_v16 = vor.u32 %v4643_v14, %v3920_v13  ;;  %v3792_v32 = vld [vmem:[%s6109_s13 + $0xa8] sm:$0xf]  ;;  %v4625_v14 = vld [vmem:[%s6109_s13 + $0x12c] sm:$0xf] }
 0x164   : > { %1968 = vmatpush.bf16.msrb.mxu0 %v3825_v11  ;;  %v3793_v38 = vor.u32 %v4611_v33, %v3792_v32  ;;  %v4627_v11 = vld [vmem:[%s6109_s13 + $0x134] sm:$0xf0]  ;;  %v3861_v17 = vor.u32 %v4625_v14, %v3858_v15  ;;  %v4593_v32 = vld [vmem:[%s6109_s13 + $0x2c] sm:$0xf]  ;;  %v3730_v33 = vld [vmem:[%s6109_s13 + $0x38] sm:$0xf0] }
 0x165   : > { %1984 = vmatpush.bf16.msrb.mxu2 %v3921_v16  ;;  %v3857_v13 = vor.u32 %v4627_v11, %v3856_v10  ;;  %v3744_v16 = vld [vmem:[%s6109_s13 + $0x48] sm:$0xf]  ;;  %v3733_v43 = vor.u32 %v4593_v32, %v3730_v33  ;;  %v4208_v14 = vld [vmem:[#allocation2 + $0x1e0] sm:$0xf]  ;;  %v4715_v15 = vld [vmem:[#allocation2 + $0x1ec] sm:$0xf0] }
 0x167   : > { %1960 = vmatpush.bf16.msrb.mxu1 %v3853_v26  ;;  %1946 = vmatpush.bf16.msra.mxu3 %v3725_v53  ;;  %v4639_v26 = vld [vmem:[%s6109_s13 + $0x194] sm:$0xf0]  ;;  %v1158_v53 = vpop.f32.mrf.mxu3 }
 0x168   : > { %v3905_v28 = vor.u32 %v4639_v26, %v3904_v25  ;;  %1969 = vmatpush.bf16.msrb.mxu0 %v3809_v22  ;;  %v3840_v22 = vld [vmem:[%s6109_s13 + $0x108] sm:$0xf]  ;;  %v3842_v26 = vld [vmem:[%s6109_s13 + $0x118] sm:$0xf0]  ;;  %v1159_v34 = vadd.f32 %v1158_v53, %v5557_v48 }
 0x169   : > { %v3841_v25 = vor.u32 %v4623_v23, %v3840_v22  ;;  %v3712_v48 = vld [vmem:[%s6109_s13 + $0x8] sm:$0xf]  ;;  %v4683_v22 = vld [vmem:[#allocation2 + $0xec] sm:$0xf0]  ;;  %v4336_v23 = vld [vmem:[#allocation2 + $0x2e0] sm:$0xf] }
 0x16a   : > { %1985 = vmatpush.bf16.msrb.mxu2 %v3905_v28  ;;  %v4595_v28 = vld [vmem:[%s6109_s13 + $0x34] sm:$0xf0]  ;;  %v2033_v53 = vld [vmem:[%s610_s22 + $0x8] sm:$0xff] }
 0x16b   : > { %1961 = vmatpush.bf16.msrb.mxu1 %v3837_v42  ;;  %1947 = vmatpush.bf16.msra.mxu3 %v3709_v6  ;;  %v4635_v42 = vld [vmem:[%s6109_s13 + $0x174] sm:$0xf0]  ;;  %v2046_v55 = vunpack.c.h.b16 %v2033_v53  ;;  %v2045_v1 = vunpack.c.l.b16 %v2033_v53  ;;  %v4400_v53 = vld [vmem:[#allocation2 + $0x360] sm:$0xf] }
 0x16c   : > { %v3889_v44 = vor.u32 %v4635_v42, %v3888_v41  ;;  %1970 = vmatpush.bf16.msrb.mxu0 %v3793_v38  ;;  %v3729_v42 = vor.u32 %v4595_v28, %v3728_v27  ;;  %v4771_v28 = vld [vmem:[#allocation2 + $0x3ac] sm:$0xf0] }
 0x16e   : > { %1986 = vmatpush.bf16.msrb.mxu2 %v3889_v44 }
 0x16f   : > { %2010 = vmatpush.bf16.msra.mxu1 %v3957_v47  ;;  %1996 = vmatpush.bf16.msrb.mxu3 %v3829_v12  ;;  %v3776_v47 = vld [vmem:[%s6109_s13 + $0x88] sm:$0xf] }
 0x170   : > { %v3777_v51 = vor.u32 %v4607_v49, %v3776_v47 }
 0x172   : > { %1971 = vmatpush.bf16.msrb.mxu0 %v3777_v51  ;;  %1987 = vmatpush.bf16.msrb.mxu2 %v3873_v60 }
 0x173   : > { %2011 = vmatpush.bf16.msra.mxu1 %v3941_v63  ;;  %1997 = vmatpush.bf16.msrb.mxu3 %v3813_v24  ;;  %v3877_v63 = vor.u32 %v4629_v59, %v3874_v61  ;;  %v4621_v24 = vld [vmem:[%s6109_s13 + $0x10c] sm:$0xf]  ;;  %v2050_v59 = vpack.c.b16 %v2046_v55, %v2046_v55  ;;  %v4763_v55 = vld [vmem:[#allocation2 + $0x36c] sm:$0xf0] }
 0x175   : > { %v2064_v0 = vsel %vm1201_vm2, %v2050_v59, 0  ;;  %v4671_v59 = vld [vmem:[#allocation2 + $0x8c] sm:$0xf0] }
 0x176   : > { %1972 = vmatpush.bf16.msrb.mxu0 %v3761_v8  ;;  %1988 = vmatpush.bf16.msrb.mxu2 %v3857_v13  ;;  %v4779_v13 = vld [vmem:[#allocation2 + $0x3ec] sm:$0xf0] }
 0x177   : > { %2012 = vmatpush.bf16.msra.mxu1 %v3925_v18  ;;  %1998 = vmatpush.bf16.msrb.mxu3 %v3797_v40  ;;  %v4597_v18 = vld [vmem:[%s6109_s13 + $0x4c] sm:$0xf] }
 0x178   : > { %v3749_v21 = vor.u32 %v4597_v18, %v3746_v19  ;;  %v4775_v18 = vld [vmem:[#allocation2 + $0x3cc] sm:$0xf0]  ;;  %v4192_v19 = vld [vmem:[#allocation2 + $0x1c0] sm:$0xf] }
 0x17a   : > { %1989 = vmatpush.bf16.msrb.mxu2 %v3841_v25 }
 0x17b   : > { %2013 = vmatpush.bf16.msra.mxu1 %v3909_v31  ;;  %1999 = vmatpush.bf16.msrb.mxu3 %v3781_v54  ;;  %v3845_v31 = vor.u32 %v4621_v24, %v3842_v26  ;;  %v2044_v54 = vunpack.c.h.b16 %v2032_v52  ;;  %v4747_v24 = vld [vmem:[#allocation2 + $0x2ec] sm:$0xf0]  ;;  %v4432_v26 = vld [vmem:[#allocation2 + $0x3a0] sm:$0xf] }
 0x17c   : > { %v4337_v33 = vor.u32 %v4747_v24, %v4336_v23  ;;  %v4128_v23 = vld [vmem:[#allocation2 + $0x140] sm:$0xf] }
 0x17d   : > { %v2048_v56 = vpack.c.b16 %v2044_v54, %v2044_v54 }
 0x17f   : > { %2014 = vmatpush.bf16.msra.mxu1 %v3893_v46  ;;  %v3714_v46 = vld [vmem:[%s6109_s13 + $0x18] sm:$0xf0] }
 0x183   : > { %2015 = vmatpush.bf16.msra.mxu1 %v3877_v63  ;;  %v2058_v63 = vsel %vm1201_vm2, %v2048_v56, 0  ;;  %v4032_v56 = vld [vmem:[#allocation2 + $0x80] sm:$0xf] }
 0x187   : > { %2016 = vmatpush.bf16.msra.mxu1 %v3861_v17  ;;  %v4448_v17 = vld [vmem:[#allocation2 + $0x3c0] sm:$0xf] }
 0x188   : > { %v4449_v25 = vor.u32 %v4775_v18, %v4448_v17  ;;  %v4735_v17 = vld [vmem:[#allocation2 + $0x28c] sm:$0xf0] }
 0x18b   : > { %2017 = vmatpush.bf16.msra.mxu1 %v3845_v31  ;;  %v4707_v31 = vld [vmem:[#allocation2 + $0x1ac] sm:$0xf0] }
 0x1ca   : > { %v1435_v62 = vpop.f32.mrf.mxu1 }
 0x1cb   : > { %v5910_v5 = vadd.f32 %v1435_v62, %v5575_v4  ;;  %v1449_v6 = vpop.f32.mrf.mxu0  ;;  %v3765_v4 = vor.u32 %v4601_v2, %v3762_v9  ;;  %v2043_v2 = vunpack.c.l.b16 %v2032_v52  ;;  %v4743_v52 = vld [vmem:[#allocation2 + $0x2cc] sm:$0xf0] }
 0x1cc   : > { %v5922_v12 = vadd.f32 %v1449_v6, %v5566_v57  ;;  %v4599_v57 = vld [vmem:[%s6109_s13 + $0x54] sm:$0xf0] }
 0x1cd   : > { %2000 = vmatpush.bf16.msrb.mxu3 %v3765_v4  ;;  %v3745_v20 = vor.u32 %v4599_v57, %v3744_v16  ;;  %v2047_v6 = vpack.c.b16 %v2043_v2, %v2043_v2  ;;  %v4464_v4 = vld [vmem:[#allocation2 + $0x3e0] sm:$0xf]  ;;  %v4209_v57 = vor.u32 %v4715_v15, %v4208_v14  ;;  %v4739_v2 = vld [vmem:[#allocation2 + $0x2ac] sm:$0xf0] }
 0x1ce   : > { %v4465_v16 = vor.u32 %v4779_v13, %v4464_v4  ;;  %v4144_v4 = vld [vmem:[#allocation2 + $0x160] sm:$0xf]  ;;  %v4699_v14 = vld [vmem:[#allocation2 + $0x16c] sm:$0xf0] }
 0x1cf   : > { %1973 = vmatpush.bf16.msrb.mxu0 %v3745_v20  ;;  %v2055_v11 = vsel %vm1201_vm2, %v2047_v6, 0  ;;  %v4711_v20 = vld [vmem:[#allocation2 + $0x1cc] sm:$0xf0]  ;;  %v4145_v15 = vor.u32 %v4699_v14, %v4144_v4  ;;  %v4066_v14 = vld [vmem:[#allocation2 + $0xd0] sm:$0xf0] }
 0x1d0   : > { %v1421_v29 = vpop.f32.mrf.mxu3  ;;  %v4193_v27 = vor.u32 %v4711_v20, %v4192_v19  ;;  %v4759_v6 = vld [vmem:[#allocation2 + $0x34c] sm:$0xf0] }
 0x1d1   : > { %v5968_v38 = vadd.f32 %v1421_v29, %v5573_v3  ;;  %v1463_v39 = vpop.f32.mrf.mxu2  ;;  %2001 = vmatpush.bf16.msrb.mxu3 %v3749_v21  ;;  %v4591_v3 = vld [vmem:[%s6109_s13 + $0x14] sm:$0xf0]  ;;  %v4080_v21 = vld [vmem:[#allocation2 + $0xe0] sm:$0xf]  ;;  %v4755_v19 = vld [vmem:[#allocation2 + $0x32c] sm:$0xf0] }
 0x1d2   : > { %v5971_v40 = vadd.f32 %v1463_v39, %v5569_v58  ;;  %v1437_v41 = vpop.f32.mrf.mxu1  ;;  %v4589_v58 = vld [vmem:[%s6109_s13 + $0xc] sm:$0xf]  ;;  %v3713_v45 = vor.u32 %v4591_v3, %v3712_v48  ;;  %v4176_v29 = vld [vmem:[#allocation2 + $0x1a0] sm:$0xf]  ;;  %v4081_v32 = vor.u32 %v4683_v22, %v4080_v21  ;;  %v4679_v39 = vld [vmem:[#allocation2 + $0xcc] sm:$0xf0] }
 0x1d3   : > { %v5973_v44 = vadd.f32 %v1437_v41, %v1159_v34  ;;  %1974 = vmatpush.bf16.msrb.mxu0 %v3729_v42  ;;  %v3717_v47 = vor.u32 %v4589_v58, %v3714_v46  ;;  %v4064_v34 = vld [vmem:[#allocation2 + $0xc0] sm:$0xf]  ;;  %v4433_v41 = vor.u32 %v4771_v28, %v4432_v26  ;;  %v4177_v42 = vor.u32 %v4707_v31, %v4176_v29  ;;  %v4767_v48 = vld [vmem:[#allocation2 + $0x38c] sm:$0xf0] }
 0x1d4   : > { %v4065_v3 = vor.u32 %v4679_v39, %v4064_v34  ;;  %v4048_v58 = vld [vmem:[#allocation2 + $0xa0] sm:$0xf]  ;;  %v4663_v22 = vld [vmem:[#allocation2 + $0x4c] sm:$0xf0]  ;;  %v4466_v34 = vld [vmem:[#allocation2 + $0x3f0] sm:$0xf0] }
 0x1d5   : > { %2002 = vmatpush.bf16.msrb.mxu3 %v3733_v43  ;;  %v4416_v43 = vld [vmem:[#allocation2 + $0x380] sm:$0xf]  ;;  %v4731_v28 = vld [vmem:[#allocation2 + $0x26c] sm:$0xf0] }
 0x1d6   : > { %v4417_v46 = vor.u32 %v4767_v48, %v4416_v43  ;;  %v4000_v21 = vld [vmem:[#allocation2 + $0x40] sm:$0xf]  ;;  %v4659_v43 = vld [vmem:[#allocation2 + $0x2c] sm:$0xf0] }
 0x1d7   : > { %1975 = vmatpush.bf16.msrb.mxu0 %v3713_v45  ;;  %v4675_v45 = vld [vmem:[#allocation2 + $0xac] sm:$0xf0]  ;;  %v4001_v24 = vor.u32 %v4663_v22, %v4000_v21  ;;  %v4352_v29 = vld [vmem:[#allocation2 + $0x300] sm:$0xf]  ;;  %v4745_v21 = vld [vmem:[#allocation2 + $0x2e4] sm:$0xf] }
 0x1d8   : > { %v1423_v49 = vpop.f32.mrf.mxu3  ;;  %v4112_v48 = vld [vmem:[#allocation2 + $0x120] sm:$0xf]  ;;  %v4338_v22 = vld [vmem:[#allocation2 + $0x2f0] sm:$0xf0] }
 0x1d9   : > { %v5993_v50 = vadd.f32 %v1423_v49, %v5577_v7  ;;  %2003 = vmatpush.bf16.msrb.mxu3 %v3717_v47  ;;  %v2049_v7 = vpack.c.b16 %v2045_v1, %v2045_v1  ;;  %v4049_v47 = vor.u32 %v4675_v45, %v4048_v58  ;;  %v4652_v49 = vld [vmem:[%s6105_s9] sm:$0xff]  ;;  %v4691_v58 = vld [vmem:[#allocation2 + $0x12c] sm:$0xf0] }
 0x1da   : > { %v1521_v51 = vpop.f32.mrf.mxu1  ;;  %v4113_v45 = vor.u32 %v4691_v58, %v4112_v48  ;;  %v6006_v48 = vpop.f32.mrf.mxu0 }
 0x1db   : > { %v2061_v10 = vsel %vm1201_vm2, %v2049_v7, 0  ;;  %v4384_v7 = vld [vmem:[#allocation2 + $0x340] sm:$0xf] }
 0x1e0   : > { %v1507_v60 = vpop.f32.mrf.mxu3 }
 0x1e2   : > { %v1523_v61 = vpop.f32.mrf.mxu1 }
 0x1e3   : > { %v1527_v62 = vpack.c.bf16 %v1523_v61, %v1521_v51  ;;  %v4320_v51 = vld [vmem:[#allocation2 + $0x2c0] sm:$0xf]  ;;  %v4033_v61 = vor.u32 %v4671_v59, %v4032_v56 }
 0x1e4   : > { %v4321_v54 = vor.u32 %v4743_v52, %v4320_v51  ;;  %v4773_v51 = vld [vmem:[#allocation2 + $0x3c4] sm:$0xf]  ;;  %v4450_v52 = vld [vmem:[#allocation2 + $0x3d0] sm:$0xf0]  ;;  %v4096_v56 = vld [vmem:[#allocation2 + $0x100] sm:$0xf] }
 0x1e5   : > { %1934 = vmatmul.bf16.vlgmr.msra.gmra.mxu2 %v1527_v62  ;;  %1962 = vmatmul.bf16.vlgmr.msrb.gmra.mxu1 %v1527_v62 }
 0x1e6   : > { %2087 = vmatpush.bf16.msra.mxu2 %v2058_v63  ;;  %2115 = vmatpush.bf16.msrb.mxu1 %v2064_v0  ;;  %v4703_v63 = vld [vmem:[#allocation2 + $0x18c] sm:$0xf0]  ;;  %v4304_v0 = vld [vmem:[#allocation2 + $0x2a0] sm:$0xf] }
 0x1e8   : > { %v1509_v8 = vpop.f32.mrf.mxu3 }
 0x1e9   : > { %v1526_v9 = vpack.c.bf16 %v1509_v8, %v1507_v60  ;;  %v4401_v60 = vor.u32 %v4763_v55, %v4400_v53  ;;  %v4305_v8 = vor.u32 %v4739_v2, %v4304_v0  ;;  %v4453_v53 = vor.u32 %v4773_v51, %v4450_v52  ;;  %v4655_v55 = vld [vmem:[#allocation2 + $0xc] sm:$0xf0]  ;;  %v4210_v2 = vld [vmem:[#allocation2 + $0x1f0] sm:$0xf0] }
 0x1ea   : > { %v4162_v51 = vld [vmem:[#allocation2 + $0x190] sm:$0xf0] }
 0x1eb   : > { %1920 = vmatmul.bf16.vlgmr.msra.gmra.mxu0 %v1526_v9  ;;  %1948 = vmatmul.bf16.vlgmr.msra.gmra.mxu3 %v1526_v9 }
 0x1ec   : > { %2101 = vmatpush.bf16.msra.mxu3 %v2061_v10  ;;  %2073 = vmatpush.bf16.msra.mxu0 %v2055_v11  ;;  %v4016_v10 = vld [vmem:[#allocation2 + $0x60] sm:$0xf]  ;;  %v4667_v11 = vld [vmem:[#allocation2 + $0x6c] sm:$0xf0] }
 0x1ed   : > { %v4017_v13 = vor.u32 %v4667_v11, %v4016_v10  ;;  %v4434_v10 = vld [vmem:[#allocation2 + $0x3b0] sm:$0xf0] }
 0x1f5   : > { %1990 = vmatmul.bf16.vlgmr.msrb.gmra.mxu2 %v1527_v62  ;;  %2018 = vmatmul.bf16.vlgmr.msra.gmra.mxu1 %v1527_v62  ;;  %v4160_v62 = vld [vmem:[#allocation2 + $0x180] sm:$0xf] }
 0x1f6   : > { %2936 = vmatpush.bf16.msra.mxu1 %v4465_v16  ;;  %2908 = vmatpush.bf16.msrb.mxu2 %v4209_v57  ;;  %v4161_v1 = vor.u32 %v4703_v63, %v4160_v62  ;;  %v4288_v16 = vld [vmem:[#allocation2 + $0x280] sm:$0xf]  ;;  %v4082_v62 = vld [vmem:[#allocation2 + $0xf0] sm:$0xf0] }
 0x1f7   : > { %v4368_v57 = vld [vmem:[#allocation2 + $0x320] sm:$0xf]  ;;  %v4289_v18 = vor.u32 %v4735_v17, %v4288_v16  ;;  %v4194_v17 = vld [vmem:[#allocation2 + $0x1d0] sm:$0xf0] }
 0x1f8   : > { %v4369_v20 = vor.u32 %v4755_v19, %v4368_v57  ;;  %v4224_v57 = vld [vmem:[#allocation2 + $0x200] sm:$0xf] }
 0x1fa   : > { %2937 = vmatpush.bf16.msra.mxu1 %v4449_v25  ;;  %2909 = vmatpush.bf16.msrb.mxu2 %v4193_v27  ;;  %v4695_v25 = vld [vmem:[#allocation2 + $0x14c] sm:$0xf0]  ;;  %v4272_v27 = vld [vmem:[#allocation2 + $0x260] sm:$0xf] }
 0x1fb   : > { %1976 = vmatmul.bf16.vlgmr.msrb.gmra.mxu0 %v1526_v9  ;;  %2004 = vmatmul.bf16.vlgmr.msrb.gmra.mxu3 %v1526_v9  ;;  %v4385_v9 = vor.u32 %v4759_v6, %v4384_v7  ;;  %v4129_v26 = vor.u32 %v4695_v25, %v4128_v23  ;;  %v4273_v31 = vor.u32 %v4731_v28, %v4272_v27  ;;  %v4240_v7 = vld [vmem:[#allocation2 + $0x220] sm:$0xf]  ;;  %v4765_v23 = vld [vmem:[#allocation2 + $0x384] sm:$0xf]  ;;  %v4418_v25 = vld [vmem:[#allocation2 + $0x390] sm:$0xf0] }
 0x1fc   : > { %2894 = vmatpush.bf16.msrb.mxu0 %v4081_v32  ;;  %2922 = vmatpush.bf16.msrb.mxu3 %v4337_v33  ;;  %v4751_v32 = vld [vmem:[#allocation2 + $0x30c] sm:$0xf0]  ;;  %v4777_v33 = vld [vmem:[#allocation2 + $0x3e4] sm:$0xf]  ;;  %v4050_v28 = vld [vmem:[#allocation2 + $0xb0] sm:$0xf0] }
 0x1fd   : > { %v4353_v39 = vor.u32 %v4751_v32, %v4352_v29  ;;  %v4673_v27 = vld [vmem:[#allocation2 + $0xa4] sm:$0xf]  ;;  %v4178_v32 = vld [vmem:[#allocation2 + $0x1b0] sm:$0xf0] }
 0x1fe   : > { %2938 = vmatpush.bf16.msra.mxu1 %v4433_v41  ;;  %2910 = vmatpush.bf16.msrb.mxu2 %v4177_v42  ;;  %v4469_v41 = vor.u32 %v4777_v33, %v4466_v34  ;;  %v3984_v42 = vld [vmem:[#allocation2 + $0x20] sm:$0xf]  ;;  %v4705_v29 = vld [vmem:[#allocation2 + $0x1a4] sm:$0xf] }
 0x1ff   : > { %v4181_v33 = vor.u32 %v4705_v29, %v4178_v32  ;;  %v4741_v34 = vld [vmem:[#allocation2 + $0x2c4] sm:$0xf] }
 0x200   : > { %2895 = vmatpush.bf16.msrb.mxu0 %v4065_v3  ;;  %2923 = vmatpush.bf16.msrb.mxu3 %v4321_v54  ;;  %v3985_v3 = vor.u32 %v4659_v43, %v3984_v42  ;;  %v3968_v54 = vld [vmem:[#allocation2] sm:$0xf]  ;;  %v4402_v43 = vld [vmem:[#allocation2 + $0x370] sm:$0xf0]  ;;  %v4657_v29 = vld [vmem:[#allocation2 + $0x24] sm:$0xf] }
 0x201   : > { %v3969_v59 = vor.u32 %v4655_v55, %v3968_v54  ;;  %v4737_v54 = vld [vmem:[#allocation2 + $0x2a4] sm:$0xf]  ;;  %v4306_v55 = vld [vmem:[#allocation2 + $0x2b0] sm:$0xf0] }
 0x202   : > { %2939 = vmatpush.bf16.msra.mxu1 %v4417_v46  ;;  %2911 = vmatpush.bf16.msrb.mxu2 %v4161_v1  ;;  %v4256_v46 = vld [vmem:[#allocation2 + $0x240] sm:$0xf]  ;;  %v4713_v1 = vld [vmem:[#allocation2 + $0x1e4] sm:$0xf] }
 0x203   : > { %v4213_v6 = vor.u32 %v4713_v1, %v4210_v2  ;;  %v4146_v2 = vld [vmem:[#allocation2 + $0x170] sm:$0xf0]  ;;  %v4689_v32 = vld [vmem:[#allocation2 + $0x124] sm:$0xf] }
 0x204   : > { %2896 = vmatpush.bf16.msrb.mxu0 %v4049_v47  ;;  %2924 = vmatpush.bf16.msrb.mxu3 %v4305_v8  ;;  %v4727_v47 = vld [vmem:[#allocation2 + $0x24c] sm:$0xf0] }
 0x205   : > { %3963 = vmatmul.msk.bf16.vlgmr.msra.gmra.mxu2 %vm1197_vm3, %v4652_v49  ;;  %3965 = vmatmul.msk.bf16.vlgmr.msrb.gmra.mxu1 %vm1197_vm3, %v4652_v49  ;;  %v4723_v8 = vld [vmem:[#allocation2 + $0x22c] sm:$0xf0] }
 0x206   : > { %2940 = vmatpush.bf16.msra.mxu1 %v4401_v60  ;;  %2912 = vmatpush.bf16.msrb.mxu2 %v4145_v15  ;;  %v4687_v60 = vld [vmem:[#allocation2 + $0x10c] sm:$0xf0]  ;;  %v4241_v11 = vor.u32 %v4723_v8, %v4240_v7  ;;  %v4709_v15 = vld [vmem:[#allocation2 + $0x1c4] sm:$0xf]  ;;  %v4290_v8 = vld [vmem:[#allocation2 + $0x290] sm:$0xf0] }
 0x207   : > { %v4097_v63 = vor.u32 %v4687_v60, %v4096_v56  ;;  %v4197_v19 = vor.u32 %v4709_v15, %v4194_v17  ;;  %v4757_v56 = vld [vmem:[#allocation2 + $0x344] sm:$0xf]  ;;  %v4386_v60 = vld [vmem:[#allocation2 + $0x350] sm:$0xf0] }
 0x208   : > { %2897 = vmatpush.bf16.msrb.mxu0 %v4033_v61  ;;  %2925 = vmatpush.bf16.msrb.mxu3 %v4289_v18  ;;  %v4681_v61 = vld [vmem:[#allocation2 + $0xe4] sm:$0xf]  ;;  %v4719_v18 = vld [vmem:[#allocation2 + $0x20c] sm:$0xf0] }
 0x209   : > { %v4085_v0 = vor.u32 %v4681_v61, %v4082_v62  ;;  %v4389_v61 = vor.u32 %v4757_v56, %v4386_v60  ;;  %v4665_v62 = vld [vmem:[#allocation2 + $0x64] sm:$0xf]  ;;  %v4098_v56 = vld [vmem:[#allocation2 + $0x110] sm:$0xf0] }
 0x20a   : > { %2941 = vmatpush.bf16.msra.mxu1 %v4385_v9  ;;  %2913 = vmatpush.bf16.msrb.mxu2 %v4129_v26  ;;  %v4769_v9 = vld [vmem:[#allocation2 + $0x3a4] sm:$0xf]  ;;  %v4421_v26 = vor.u32 %v4765_v23, %v4418_v25  ;;  %v4274_v23 = vld [vmem:[#allocation2 + $0x270] sm:$0xf0] }
 0x20b   : > { %3962 = vmatmul.msk.bf16.vlgmr.msra.gmra.mxu0 %vm1197_vm3, %v4652_v49  ;;  %3964 = vmatmul.msk.bf16.vlgmr.msra.gmra.mxu3 %vm1197_vm3, %v4652_v49  ;;  %v4257_v49 = vor.u32 %v4727_v47, %v4256_v46  ;;  %v4437_v4 = vor.u32 %v4769_v9, %v4434_v10  ;;  %v4034_v46 = vld [vmem:[#allocation2 + $0x90] sm:$0xf0]  ;;  %v4701_v47 = vld [vmem:[#allocation2 + $0x184] sm:$0xf] }
 0x20c   : > { %2898 = vmatpush.bf16.msrb.mxu0 %v4017_v13  ;;  %2926 = vmatpush.bf16.msrb.mxu3 %v4273_v31  ;;  %v4677_v13 = vld [vmem:[#allocation2 + $0xc4] sm:$0xf]  ;;  %v4053_v31 = vor.u32 %v4673_v27, %v4050_v28  ;;  %v4354_v27 = vld [vmem:[#allocation2 + $0x310] sm:$0xf0] }
 0x20d   : > { %v4069_v16 = vor.u32 %v4677_v13, %v4066_v14  ;;  %v4753_v9 = vld [vmem:[#allocation2 + $0x324] sm:$0xf] }
 0x20e   : > { %2942 = vmatpush.bf16.msra.mxu1 %v4369_v20  ;;  %2914 = vmatpush.bf16.msrb.mxu2 %v4113_v45  ;;  %v4225_v20 = vor.u32 %v4719_v18, %v4224_v57  ;;  %v4669_v45 = vld [vmem:[#allocation2 + $0x84] sm:$0xf] }
 0x20f   : > { %v4661_v15 = vld [vmem:[#allocation2 + $0x44] sm:$0xf] }
 0x210   : > { %2899 = vmatpush.bf16.msrb.mxu0 %v4001_v24  ;;  %2927 = vmatpush.bf16.msrb.mxu3 %v4257_v49  ;;  %v4341_v24 = vor.u32 %v4745_v21, %v4338_v22  ;;  %v4037_v49 = vor.u32 %v4669_v45, %v4034_v46  ;;  %v4693_v17 = vld [vmem:[#allocation2 + $0x144] sm:$0xf] }
 0x211   : > { %v4729_v22 = vld [vmem:[#allocation2 + $0x264] sm:$0xf] }
 0x212   : > { %2943 = vmatpush.bf16.msra.mxu1 %v4353_v39  ;;  %2915 = vmatpush.bf16.msrb.mxu2 %v4097_v63  ;;  %v4322_v39 = vld [vmem:[#allocation2 + $0x2d0] sm:$0xf0] }
 0x213   : > { %v4325_v42 = vor.u32 %v4741_v34, %v4322_v39  ;;  %v4018_v63 = vld [vmem:[#allocation2 + $0x70] sm:$0xf0] }
 0x214   : > { %2900 = vmatpush.bf16.msrb.mxu0 %v3985_v3  ;;  %2928 = vmatpush.bf16.msrb.mxu3 %v4241_v11  ;;  %v6008_v3 = vpop.f32.mrf.mxu2  ;;  %v4021_v1 = vor.u32 %v4665_v62, %v4018_v63  ;;  %v4370_v11 = vld [vmem:[#allocation2 + $0x330] sm:$0xf0] }
 0x215   : > { %v4373_v14 = vor.u32 %v4753_v9, %v4370_v11  ;;  %v4114_v34 = vld [vmem:[#allocation2 + $0x130] sm:$0xf0] }
 0x216   : > { %2992 = vmatpush.bf16.msrb.mxu1 %v4469_v41  ;;  %2964 = vmatpush.bf16.msra.mxu2 %v4213_v6  ;;  %v4761_v41 = vld [vmem:[#allocation2 + $0x364] sm:$0xf]  ;;  %v4242_v62 = vld [vmem:[#allocation2 + $0x230] sm:$0xf0] }
 0x217   : > { %v4405_v58 = vor.u32 %v4761_v41, %v4402_v43  ;;  %v4733_v6 = vld [vmem:[#allocation2 + $0x284] sm:$0xf]  ;;  %v4117_v41 = vor.u32 %v4689_v32, %v4114_v34  ;;  %v4258_v43 = vld [vmem:[#allocation2 + $0x250] sm:$0xf0]  ;;  %v4716_v32 = vld [vmem:[#allocation2 + $0x1f4] sm:$0xf0] }
 0x218   : > { %2901 = vmatpush.bf16.msrb.mxu0 %v3969_v59  ;;  %2929 = vmatpush.bf16.msrb.mxu3 %v4225_v20  ;;  %v4309_v59 = vor.u32 %v4737_v54, %v4306_v55  ;;  %v4293_v10 = vor.u32 %v4733_v6, %v4290_v8  ;;  %v4440_v34 = vld [vmem:[#allocation2 + $0x3a8] sm:$0xf] }
 0x21a   : > { %2993 = vmatpush.bf16.msrb.mxu1 %v4453_v53  ;;  %2965 = vmatpush.bf16.msra.mxu2 %v4197_v19  ;;  %v4165_v53 = vor.u32 %v4701_v47, %v4162_v51  ;;  %v4130_v19 = vld [vmem:[#allocation2 + $0x150] sm:$0xf0]  ;;  %v4653_v47 = vld [vmem:[#allocation2 + $0x4] sm:$0xf] }
 0x21b   : > { %v4133_v21 = vor.u32 %v4693_v17, %v4130_v19  ;;  %v4685_v51 = vld [vmem:[#allocation2 + $0x104] sm:$0xf] }
 0x21c   : > { %2950 = vmatpush.bf16.msra.mxu0 %v4085_v0  ;;  %2978 = vmatpush.bf16.msra.mxu3 %v4341_v24  ;;  %v4697_v0 = vld [vmem:[#allocation2 + $0x164] sm:$0xf]  ;;  %v4101_v60 = vor.u32 %v4685_v51, %v4098_v56  ;;  %v4712_v51 = vld [vmem:[#allocation2 + $0x1d4] sm:$0xf0] }
 0x21d   : > { %v4149_v7 = vor.u32 %v4697_v0, %v4146_v2  ;;  %v4749_v24 = vld [vmem:[#allocation2 + $0x304] sm:$0xf]  ;;  %v4226_v2 = vld [vmem:[#allocation2 + $0x210] sm:$0xf0]  ;;  %v4748_v56 = vld [vmem:[#allocation2 + $0x2f4] sm:$0xf0] }
 0x21e   : > { %2994 = vmatpush.bf16.msrb.mxu1 %v4437_v4  ;;  %2966 = vmatpush.bf16.msra.mxu2 %v4181_v33  ;;  %v4357_v28 = vor.u32 %v4749_v24, %v4354_v27 }
 0x220   : > { %2951 = vmatpush.bf16.msra.mxu0 %v4069_v16  ;;  %2979 = vmatpush.bf16.msra.mxu3 %v4325_v42  ;;  %v4002_v16 = vld [vmem:[#allocation2 + $0x50] sm:$0xf0]  ;;  %v4725_v42 = vld [vmem:[#allocation2 + $0x244] sm:$0xf] }
 0x221   : > { %v4005_v18 = vor.u32 %v4661_v15, %v4002_v16 }
 0x222   : > { %2995 = vmatpush.bf16.msrb.mxu1 %v4421_v26  ;;  %2967 = vmatpush.bf16.msra.mxu2 %v4165_v53  ;;  %v4277_v26 = vor.u32 %v4729_v22, %v4274_v23 }
 0x224   : > { %2952 = vmatpush.bf16.msra.mxu0 %v4053_v31  ;;  %2980 = vmatpush.bf16.msra.mxu3 %v4309_v59  ;;  %v3986_v31 = vld [vmem:[#allocation2 + $0x30] sm:$0xf0] }
 0x225   : > { %v3989_v33 = vor.u32 %v4657_v29, %v3986_v31  ;;  %v4776_v29 = vld [vmem:[#allocation2 + $0x3d4] sm:$0xf0]  ;;  %v4088_v31 = vld [vmem:[#allocation2 + $0xe8] sm:$0xf] }
 0x226   : > { %2996 = vmatpush.bf16.msrb.mxu1 %v4405_v58  ;;  %2968 = vmatpush.bf16.msra.mxu2 %v4149_v7 }
 0x228   : > { %2953 = vmatpush.bf16.msra.mxu0 %v4037_v49  ;;  %2981 = vmatpush.bf16.msra.mxu3 %v4293_v10  ;;  %v3970_v49 = vld [vmem:[#allocation2 + $0x10] sm:$0xf0] }
 0x229   : > { %v3973_v55 = vor.u32 %v4653_v47, %v3970_v49  ;;  %v4680_v47 = vld [vmem:[#allocation2 + $0xd4] sm:$0xf0]  ;;  %v4200_v49 = vld [vmem:[#allocation2 + $0x1c8] sm:$0xf] }
 0x22a   : > { %2997 = vmatpush.bf16.msrb.mxu1 %v4389_v61  ;;  %2969 = vmatpush.bf16.msra.mxu2 %v4133_v21  ;;  %v4721_v61 = vld [vmem:[#allocation2 + $0x224] sm:$0xf] }
 0x22b   : > { %v4245_v63 = vor.u32 %v4721_v61, %v4242_v62  ;;  %v4201_v62 = vor.u32 %v4712_v51, %v4200_v49  ;;  %v4280_v49 = vld [vmem:[#allocation2 + $0x268] sm:$0xf]  ;;  %v4732_v51 = vld [vmem:[#allocation2 + $0x274] sm:$0xf0] }
 0x22c   : > { %2954 = vmatpush.bf16.msra.mxu0 %v4021_v1  ;;  %2982 = vmatpush.bf16.msra.mxu3 %v4277_v26  ;;  %v4717_v1 = vld [vmem:[#allocation2 + $0x204] sm:$0xf] }
 0x22d   : > { %v4229_v7 = vor.u32 %v4717_v1, %v4226_v2  ;;  %v4184_v1 = vld [vmem:[#allocation2 + $0x1a8] sm:$0xf]  ;;  %v4708_v2 = vld [vmem:[#allocation2 + $0x1b4] sm:$0xf0] }
 0x22e   : > { %2998 = vmatpush.bf16.msrb.mxu1 %v4373_v14  ;;  %2970 = vmatpush.bf16.msra.mxu2 %v4117_v41 }
 0x230   : > { %2955 = vmatpush.bf16.msra.mxu0 %v4005_v18 }
 0x232   : > { %2999 = vmatpush.bf16.msrb.mxu1 %v4357_v28  ;;  %2971 = vmatpush.bf16.msra.mxu2 %v4101_v60  ;;  %v4456_v28 = vld [vmem:[#allocation2 + $0x3c8] sm:$0xf]  ;;  %v4768_v60 = vld [vmem:[#allocation2 + $0x394] sm:$0xf0] }
 0x234   : > { %2956 = vmatpush.bf16.msra.mxu0 %v3989_v33  ;;  %v4457_v33 = vor.u32 %v4776_v29, %v4456_v28  ;;  %v4152_v28 = vld [vmem:[#allocation2 + $0x168] sm:$0xf]  ;;  %v4700_v29 = vld [vmem:[#allocation2 + $0x174] sm:$0xf0] }
 0x238   : > { %2957 = vmatpush.bf16.msra.mxu0 %v3973_v55  ;;  %v4344_v55 = vld [vmem:[#allocation2 + $0x2e8] sm:$0xf] }
 0x262   : > { %v1963_v52 = vpop.f32.mrf.mxu1 }
 0x268   : > { %v1921_v4 = vpop.f32.mrf.mxu0  ;;  %v1935_v13 = vpop.f32.mrf.mxu2 }
 0x269   : > { %v1936_v57 = vadd.f32 %v1935_v13, %v1921_v4  ;;  %v1173_v13 = vadd.f32 %v5848_v30, %v5527_v35  ;;  %v4472_v35 = vld [vmem:[#allocation2 + $0x3e8] sm:$0xf]  ;;  %v4780_v30 = vld [vmem:[#allocation2 + $0x3f4] sm:$0xf0] }
 0x26a   : > { %v1965_v20 = vpop.f32.mrf.mxu1 }
 0x26b   : > { %v6011_v25 = vadd.f32 %v1936_v57, %v5968_v38  ;;  %v4261_v38 = vor.u32 %v4725_v42, %v4258_v43  ;;  %v1474_v17 = vadd.f32 %v6006_v48, %v1173_v13  ;;  %v4764_v13 = vld [vmem:[#allocation2 + $0x374] sm:$0xf0] }
 0x26d   : > { %2983 = vmatpush.bf16.msra.mxu3 %v4261_v38  ;;  %v4072_v38 = vld [vmem:[#allocation2 + $0xc8] sm:$0xf] }
 0x26e   : > { %v1949_v39 = vpop.f32.mrf.mxu3  ;;  %v4073_v61 = vor.u32 %v4680_v47, %v4072_v38 }
 0x26f   : > { %v1964_v58 = vadd.f32 %v1963_v52, %v1949_v39  ;;  %v4772_v39 = vld [vmem:[#allocation2 + $0x3b4] sm:$0xf0] }
 0x270   : > { %v1923_v45 = vpop.f32.mrf.mxu0  ;;  %v1937_v46 = vpop.f32.mrf.mxu2 }
 0x271   : > { %v6014_v53 = vadd.f32 %v1964_v58, %v5910_v5  ;;  %v1938_v54 = vadd.f32 %v1937_v46, %v1923_v45  ;;  %2984 = vmatpush.bf16.msra.mxu3 %v4245_v63  ;;  %v4056_v63 = vld [vmem:[#allocation2 + $0xa8] sm:$0xf] }
 0x272   : > { %v2019_v59 = vpop.f32.mrf.mxu1 }
 0x273   : > { %v6017_v52 = vadd.f32 %v1938_v54, %v5993_v50  ;;  %v4441_v54 = vor.u32 %v4772_v39, %v4440_v34  ;;  %v4153_v39 = vor.u32 %v4700_v29, %v4152_v28  ;;  %v4442_v28 = vld [vmem:[#allocation2 + $0x3b8] sm:$0xf0] }
 0x275   : > { %2985 = vmatpush.bf16.msra.mxu3 %v4229_v7  ;;  %v4345_v7 = vor.u32 %v4748_v56, %v4344_v55  ;;  %v4752_v55 = vld [vmem:[#allocation2 + $0x314] sm:$0xf0] }
 0x276   : > { %v1951_v0 = vpop.f32.mrf.mxu3 }
 0x277   : > { %v1966_v5 = vadd.f32 %v1965_v20, %v1951_v0  ;;  %v4676_v0 = vld [vmem:[#allocation2 + $0xb4] sm:$0xf0] }
 0x278   : > { %v1977_v6 = vpop.f32.mrf.mxu0  ;;  %v1991_v8 = vpop.f32.mrf.mxu2 }
 0x279   : > { %v6020_v9 = vadd.f32 %v1966_v5, %v5973_v44  ;;  %v1992_v10 = vadd.f32 %v1991_v8, %v1977_v6  ;;  %v4328_v8 = vld [vmem:[#allocation2 + $0x2c8] sm:$0xf] }
 0x27a   : > { %v2021_v11 = vpop.f32.mrf.mxu1 }
 0x27b   : > { %v6023_v50 = vadd.f32 %v1992_v10, %v5922_v12  ;;  %v1187_v12 = vadd.f32 %v5859_v37, %v5529_v36  ;;  %v4684_v36 = vld [vmem:[#allocation2 + $0xf4] sm:$0xf0]  ;;  %v4216_v37 = vld [vmem:[#allocation2 + $0x1e8] sm:$0xf] }
 0x27c   : > { %v4089_v43 = vor.u32 %v4684_v36, %v4088_v31  ;;  %v4217_v58 = vor.u32 %v4716_v32, %v4216_v37  ;;  %v4296_v37 = vld [vmem:[#allocation2 + $0x288] sm:$0xf]  ;;  %v4736_v32 = vld [vmem:[#allocation2 + $0x294] sm:$0xf0] }
 0x27d   : > { %v1475_v21 = vadd.f32 %v6008_v3, %v1187_v12  ;;  %v4297_v38 = vor.u32 %v4736_v32, %v4296_v37  ;;  %v4074_v32 = vld [vmem:[#allocation2 + $0xd8] sm:$0xf0] }
 0x27e   : > { %v2005_v4 = vpop.f32.mrf.mxu3 }
 0x27f   : > { %v2020_v14 = vadd.f32 %v2019_v59, %v2005_v4  ;;  %v4424_v59 = vld [vmem:[#allocation2 + $0x388] sm:$0xf] }
 0x280   : > { %v1979_v15 = vpop.f32.mrf.mxu0  ;;  %v1993_v16 = vpop.f32.mrf.mxu2  ;;  %v4425_v6 = vor.u32 %v4768_v60, %v4424_v59  ;;  %v4408_v4 = vld [vmem:[#allocation2 + $0x368] sm:$0xf]  ;;  %v4778_v60 = vld [vmem:[#allocation2 + $0x3ec] sm:$0xf] }
 0x281   : > { %v6029_v57 = vadd.f32 %v2020_v14, %v5971_v40  ;;  %v1994_v44 = vadd.f32 %v1993_v16, %v1979_v15  ;;  %v4473_v40 = vor.u32 %v4780_v30, %v4472_v35  ;;  %v4057_v14 = vor.u32 %v4676_v0, %v4056_v63  ;;  %v4040_v16 = vld [vmem:[#allocation2 + $0x88] sm:$0xf]  ;;  %v4760_v30 = vld [vmem:[#allocation2 + $0x354] sm:$0xf0] }
 0x282   : > { %v2117_v18 = vpop.f32.mrf.mxu1  ;;  %v4185_v15 = vor.u32 %v4708_v2, %v4184_v1  ;;  %v4392_v35 = vld [vmem:[#allocation2 + $0x348] sm:$0xf]  ;;  %v4660_v63 = vld [vmem:[#allocation2 + $0x34] sm:$0xf0]  ;;  %v4281_v2 = vor.u32 %v4732_v51, %v4280_v49  ;;  %v4674_v51 = vld [vmem:[#allocation2 + $0xac] sm:$0xf] }
 0x283   : > { %v6031_v19 = vadd.f32 %v1994_v44, %v1474_v17  ;;  %v4672_v17 = vld [vmem:[#allocation2 + $0x94] sm:$0xf0]  ;;  %v4168_v44 = vld [vmem:[#allocation2 + $0x188] sm:$0xf]  ;;  %v4393_v36 = vor.u32 %v4760_v30, %v4392_v35 }
 0x284   : > { %v4120_v0 = vld [vmem:[#allocation2 + $0x128] sm:$0xf]  ;;  %v4692_v1 = vld [vmem:[#allocation2 + $0x134] sm:$0xf0] }
 0x285   : > { %v4248_v30 = vld [vmem:[#allocation2 + $0x228] sm:$0xf] }
 0x286   : > { %v2007_v20 = vpop.f32.mrf.mxu3 }
 0x287   : > { %v2022_v22 = vadd.f32 %v2021_v11, %v2007_v20  ;;  %v4744_v11 = vld [vmem:[#allocation2 + $0x2d4] sm:$0xf0]  ;;  %v4409_v20 = vor.u32 %v4764_v13, %v4408_v4  ;;  %v4121_v13 = vor.u32 %v4692_v1, %v4120_v0  ;;  %v4762_v0 = vld [vmem:[#allocation2 + $0x36c] sm:$0xf]  ;;  %v4410_v1 = vld [vmem:[#allocation2 + $0x378] sm:$0xf0] }
 0x288   : > { %v2075_v23 = vpop.f32.mrf.mxu0  ;;  %v2089_v24 = vpop.f32.mrf.mxu2  ;;  %v4329_v12 = vor.u32 %v4744_v11, %v4328_v8  ;;  %v4728_v8 = vld [vmem:[#allocation2 + $0x254] sm:$0xf0]  ;;  %v4774_v11 = vld [vmem:[#allocation2 + $0x3cc] sm:$0xf] }
 0x289   : > { %v6036_v26 = vadd.f32 %v2022_v22, %v1475_v21  ;;  %v4312_v21 = vld [vmem:[#allocation2 + $0x2a8] sm:$0xf]  ;;  %v4740_v22 = vld [vmem:[#allocation2 + $0x2b4] sm:$0xf0] }
 0x28a   : > { %v2119_v48 = vpop.f32.mrf.mxu1  ;;  %v4313_v31 = vor.u32 %v4740_v22, %v4312_v21  ;;  %v4714_v21 = vld [vmem:[#allocation2 + $0x1ec] sm:$0xf]  ;;  %v4218_v22 = vld [vmem:[#allocation2 + $0x1f8] sm:$0xf0] }
 0x28b   : > { %v6038_v27 = vpack.c.bf16 %v2119_v48, %v2117_v18  ;;  %v4704_v18 = vld [vmem:[#allocation2 + $0x194] sm:$0xf0]  ;;  %v4024_v48 = vld [vmem:[#allocation2 + $0x68] sm:$0xf] }
 0x28d   : > { %2944 = vmatmul.bf16.vlgmr.msra.gmra.mxu1 %v6038_v27 }
 0x28e   : > { %3048 = vmatpush.bf16.msra.mxu1 %v4473_v40  ;;  %v2103_v3 = vpop.f32.mrf.mxu3  ;;  %v4668_v40 = vld [vmem:[#allocation2 + $0x74] sm:$0xf0] }
 0x28f   : > { %v4025_v34 = vor.u32 %v4668_v40, %v4024_v48  ;;  %v4770_v40 = vld [vmem:[#allocation2 + $0x3ac] sm:$0xf] }
 0x290   : > { %v2077_v41 = vpop.f32.mrf.mxu0  ;;  %v2091_v42 = vpop.f32.mrf.mxu2 }
 0x291   : > { %v6041_v45 = vpack.c.bf16 %v2077_v41, %v2075_v23  ;;  %v6043_v46 = vpack.c.bf16 %v2091_v42, %v2089_v24  ;;  %v4041_v23 = vor.u32 %v4672_v17, %v4040_v16  ;;  %v4169_v24 = vor.u32 %v4704_v18, %v4168_v44  ;;  %v4008_v41 = vld [vmem:[#allocation2 + $0x48] sm:$0xf]  ;;  %v4664_v42 = vld [vmem:[#allocation2 + $0x54] sm:$0xf0]  ;;  %v4682_v18 = vld [vmem:[#allocation2 + $0xec] sm:$0xf] }
 0x292   : > { %3049 = vmatpush.bf16.msra.mxu1 %v4457_v33  ;;  %v4756_v33 = vld [vmem:[#allocation2 + $0x334] sm:$0xf0]  ;;  %v4009_v56 = vor.u32 %v4664_v42, %v4008_v41  ;;  %v4104_v17 = vld [vmem:[#allocation2 + $0x108] sm:$0xf]  ;;  %v4746_v42 = vld [vmem:[#allocation2 + $0x2ec] sm:$0xf] }
 0x293   : > { %2902 = vmatmul.bf16.vlgmr.msrb.gmra.mxu0 %v6041_v45  ;;  %2916 = vmatmul.bf16.vlgmr.msrb.gmra.mxu2 %v6043_v46  ;;  %v4656_v16 = vld [vmem:[#allocation2 + $0x14] sm:$0xf0] }
 0x294   : > { %3006 = vmatpush.bf16.msrb.mxu0 %v4089_v43  ;;  %3020 = vmatpush.bf16.msrb.mxu2 %v4217_v58  ;;  %v4136_v43 = vld [vmem:[#allocation2 + $0x148] sm:$0xf]  ;;  %v4696_v58 = vld [vmem:[#allocation2 + $0x154] sm:$0xf0] }
 0x295   : > { %v4137_v59 = vor.u32 %v4696_v58, %v4136_v43  ;;  %v4688_v44 = vld [vmem:[#allocation2 + $0x114] sm:$0xf0]  ;;  %v4346_v43 = vld [vmem:[#allocation2 + $0x2f8] sm:$0xf0]  ;;  %v4766_v58 = vld [vmem:[#allocation2 + $0x38c] sm:$0xf] }
 0x296   : > { %3050 = vmatpush.bf16.msra.mxu1 %v4441_v54  ;;  %v2105_v5 = vpop.f32.mrf.mxu3  ;;  %v4360_v54 = vld [vmem:[#allocation2 + $0x308] sm:$0xf]  ;;  %v4105_v48 = vor.u32 %v4688_v44, %v4104_v17  ;;  %v4720_v41 = vld [vmem:[#allocation2 + $0x214] sm:$0xf0]  ;;  %v4394_v17 = vld [vmem:[#allocation2 + $0x358] sm:$0xf0] }
 0x297   : > { %v6047_v10 = vpack.c.bf16 %v2105_v5, %v2103_v3  ;;  %v4376_v3 = vld [vmem:[#allocation2 + $0x328] sm:$0xf]  ;;  %v4361_v5 = vor.u32 %v4752_v55, %v4360_v54  ;;  %v4058_v55 = vld [vmem:[#allocation2 + $0xb8] sm:$0xf0] }
 0x298   : > { %3007 = vmatpush.bf16.msrb.mxu0 %v4073_v61  ;;  %3021 = vmatpush.bf16.msrb.mxu2 %v4201_v62  ;;  %v4377_v47 = vor.u32 %v4756_v33, %v4376_v3  ;;  %v4474_v61 = vld [vmem:[#allocation2 + $0x3f8] sm:$0xf0]  ;;  %v3992_v62 = vld [vmem:[#allocation2 + $0x28] sm:$0xf]  ;;  %v4710_v3 = vld [vmem:[#allocation2 + $0x1cc] sm:$0xf] }
 0x299   : > { %2930 = vmatmul.bf16.vlgmr.msrb.gmra.mxu3 %v6047_v10  ;;  %v3993_v4 = vor.u32 %v4660_v63, %v3992_v62  ;;  %v4202_v33 = vld [vmem:[#allocation2 + $0x1d8] sm:$0xf0]  ;;  %v4742_v62 = vld [vmem:[#allocation2 + $0x2cc] sm:$0xf] }
 0x29a   : > { %3034 = vmatpush.bf16.msrb.mxu3 %v4345_v7  ;;  %3051 = vmatpush.bf16.msra.mxu1 %v4425_v6  ;;  %v4477_v7 = vor.u32 %v4778_v60, %v4474_v61  ;;  %v4264_v6 = vld [vmem:[#allocation2 + $0x248] sm:$0xf]  ;;  %v4205_v49 = vor.u32 %v4710_v3, %v4202_v33  ;;  %v4349_v60 = vor.u32 %v4746_v42, %v4346_v43  ;;  %v4330_v63 = vld [vmem:[#allocation2 + $0x2d8] sm:$0xf0] }
 0x29b   : > { %v4362_v42 = vld [vmem:[#allocation2 + $0x318] sm:$0xf0] }
 0x29c   : > { %3008 = vmatpush.bf16.msrb.mxu0 %v4057_v14  ;;  %3022 = vmatpush.bf16.msrb.mxu2 %v4185_v15  ;;  %v4458_v14 = vld [vmem:[#allocation2 + $0x3d8] sm:$0xf0]  ;;  %v3976_v15 = vld [vmem:[#allocation2 + $0x8] sm:$0xf] }
 0x29d   : > { %3000 = vmatmul.bf16.vlgmr.msrb.gmra.mxu1 %v6038_v27  ;;  %v4461_v35 = vor.u32 %v4774_v11, %v4458_v14  ;;  %v4170_v11 = vld [vmem:[#allocation2 + $0x198] sm:$0xf0]  ;;  %v4738_v14 = vld [vmem:[#allocation2 + $0x2ac] sm:$0xf] }
 0x29e   : > { %3035 = vmatpush.bf16.msrb.mxu3 %v4329_v12  ;;  %3052 = vmatpush.bf16.msra.mxu1 %v4409_v20  ;;  %v4265_v12 = vor.u32 %v4728_v8, %v4264_v6  ;;  %v4090_v20 = vld [vmem:[#allocation2 + $0xf8] sm:$0xf0]  ;;  %v4702_v8 = vld [vmem:[#allocation2 + $0x18c] sm:$0xf] }
 0x29f   : > { %v4093_v29 = vor.u32 %v4682_v18, %v4090_v20  ;;  %v4042_v6 = vld [vmem:[#allocation2 + $0x98] sm:$0xf0]  ;;  %v4173_v18 = vor.u32 %v4702_v8, %v4170_v11 }
 0x2a0   : > { %3009 = vmatpush.bf16.msrb.mxu0 %v4041_v23  ;;  %3023 = vmatpush.bf16.msrb.mxu2 %v4169_v24  ;;  %v4724_v23 = vld [vmem:[#allocation2 + $0x234] sm:$0xf0]  ;;  %v3977_v24 = vor.u32 %v4656_v16, %v3976_v15  ;;  %v4314_v15 = vld [vmem:[#allocation2 + $0x2b8] sm:$0xf0]  ;;  %v4758_v16 = vld [vmem:[#allocation2 + $0x34c] sm:$0xf] }
 0x2a1   : > { %v4249_v37 = vor.u32 %v4724_v23, %v4248_v30  ;;  %v4026_v20 = vld [vmem:[#allocation2 + $0x78] sm:$0xf0]  ;;  %v4397_v30 = vor.u32 %v4758_v16, %v4394_v17  ;;  %v4734_v23 = vld [vmem:[#allocation2 + $0x28c] sm:$0xf] }
 0x2a2   : > { %3036 = vmatpush.bf16.msrb.mxu3 %v4313_v31  ;;  %3053 = vmatpush.bf16.msra.mxu1 %v4393_v36  ;;  %v4221_v31 = vor.u32 %v4714_v21, %v4218_v22  ;;  %v4678_v36 = vld [vmem:[#allocation2 + $0xcc] sm:$0xf]  ;;  %v4154_v22 = vld [vmem:[#allocation2 + $0x178] sm:$0xf0] }
 0x2a3   : > { %2958 = vmatmul.bf16.vlgmr.msra.gmra.mxu0 %v6041_v45  ;;  %2972 = vmatmul.bf16.vlgmr.msra.gmra.mxu2 %v6043_v46  ;;  %v4698_v21 = vld [vmem:[#allocation2 + $0x16c] sm:$0xf] }
 0x2a4   : > { %3010 = vmatpush.bf16.msrb.mxu0 %v4025_v34  ;;  %3024 = vmatpush.bf16.msrb.mxu2 %v4153_v39  ;;  %v4445_v34 = vor.u32 %v4770_v40, %v4442_v28  ;;  %v4232_v39 = vld [vmem:[#allocation2 + $0x208] sm:$0xf]  ;;  %v4378_v40 = vld [vmem:[#allocation2 + $0x338] sm:$0xf0] }
 0x2a5   : > { %v4233_v54 = vor.u32 %v4720_v41, %v4232_v39  ;;  %v4282_v39 = vld [vmem:[#allocation2 + $0x278] sm:$0xf0]  ;;  %v4750_v41 = vld [vmem:[#allocation2 + $0x30c] sm:$0xf] }
 0x2a6   : > { %3037 = vmatpush.bf16.msrb.mxu3 %v4297_v38  ;;  %3054 = vmatpush.bf16.msra.mxu1 %v4377_v47  ;;  %v4426_v38 = vld [vmem:[#allocation2 + $0x398] sm:$0xf0]  ;;  %v4077_v47 = vor.u32 %v4678_v36, %v4074_v32 }
 0x2a7   : > { %v4429_v61 = vor.u32 %v4766_v58, %v4426_v38  ;;  %v4010_v36 = vld [vmem:[#allocation2 + $0x58] sm:$0xf0]  ;;  %v4658_v38 = vld [vmem:[#allocation2 + $0x2c] sm:$0xf] }
 0x2a8   : > { %3011 = vmatpush.bf16.msrb.mxu0 %v4009_v56  ;;  %3025 = vmatpush.bf16.msrb.mxu2 %v4137_v59  ;;  %v4706_v56 = vld [vmem:[#allocation2 + $0x1ac] sm:$0xf]  ;;  %v4186_v59 = vld [vmem:[#allocation2 + $0x1b8] sm:$0xf0] }
 0x2a9   : > { %2986 = vmatmul.bf16.vlgmr.msra.gmra.mxu3 %v6047_v10  ;;  %v4138_v32 = vld [vmem:[#allocation2 + $0x158] sm:$0xf0] }
 0x2aa   : > { %3038 = vmatpush.bf16.msrb.mxu3 %v4281_v2  ;;  %3055 = vmatpush.bf16.msra.mxu1 %v4361_v5  ;;  %v4061_v2 = vor.u32 %v4674_v51, %v4058_v55  ;;  %v4189_v5 = vor.u32 %v4706_v56, %v4186_v59  ;;  %v4122_v51 = vld [vmem:[#allocation2 + $0x138] sm:$0xf0]  ;;  %v4365_v55 = vor.u32 %v4750_v41, %v4362_v42  ;;  %v4726_v56 = vld [vmem:[#allocation2 + $0x24c] sm:$0xf] }
 0x2ab   : > { %v4266_v59 = vld [vmem:[#allocation2 + $0x258] sm:$0xf0] }
 0x2ac   : > { %3012 = vmatpush.bf16.msrb.mxu0 %v3993_v4  ;;  %3026 = vmatpush.bf16.msrb.mxu2 %v4121_v13  ;;  %v4333_v4 = vor.u32 %v4742_v62, %v4330_v63  ;;  %v4413_v13 = vor.u32 %v4762_v0, %v4410_v1  ;;  %v4654_v62 = vld [vmem:[#allocation2 + $0xc] sm:$0xf]  ;;  %v3978_v63 = vld [vmem:[#allocation2 + $0x18] sm:$0xf0] }
 0x2ad   : > { %3056 = vmatmul.bf16.vlgmr.msra.gmra.mxu1 %v6038_v27  ;;  %v4686_v0 = vld [vmem:[#allocation2 + $0x10c] sm:$0xf]  ;;  %v4106_v1 = vld [vmem:[#allocation2 + $0x118] sm:$0xf0] }
 0x2ae   : > { %3104 = vmatpush.bf16.msrb.mxu1 %v4477_v7  ;;  %3039 = vmatpush.bf16.msrb.mxu3 %v4265_v12  ;;  %v4670_v7 = vld [vmem:[#allocation2 + $0x8c] sm:$0xf]  ;;  %v4109_v8 = vor.u32 %v4686_v0, %v4106_v1 }
 0x2af   : > { %v4045_v44 = vor.u32 %v4670_v7, %v4042_v6  ;;  %v4666_v12 = vld [vmem:[#allocation2 + $0x6c] sm:$0xf]  ;;  %v4250_v7 = vld [vmem:[#allocation2 + $0x238] sm:$0xf0]  ;;  %v3981_v6 = vor.u32 %v4654_v62, %v3978_v63 }
 0x2b0   : > { %3013 = vmatpush.bf16.msrb.mxu0 %v3977_v24  ;;  %3027 = vmatpush.bf16.msrb.mxu2 %v4105_v48  ;;  %v4298_v24 = vld [vmem:[#allocation2 + $0x298] sm:$0xf0]  ;;  %v4754_v48 = vld [vmem:[#allocation2 + $0x32c] sm:$0xf]  ;;  %v4029_v28 = vor.u32 %v4666_v12, %v4026_v20  ;;  %v6065_v12 = vld [vmem:[%s6111_s15] sm:$0xf] }
 0x2b1   : > { %v4301_v3 = vor.u32 %v4734_v23, %v4298_v24  ;;  %v4381_v33 = vor.u32 %v4754_v48, %v4378_v40  ;;  %v3130_v62 = vperm.slane %v6065_v12, 2 }
 0x2b2   : > { %3105 = vmatpush.bf16.msrb.mxu1 %v4461_v35  ;;  %3040 = vmatpush.bf16.msrb.mxu3 %v4249_v37  ;;  %v4317_v35 = vor.u32 %v4738_v14, %v4314_v15  ;;  %v4694_v37 = vld [vmem:[#allocation2 + $0x14c] sm:$0xf] }
 0x2b3   : > { %3014 = vmatmul.bf16.vlgmr.msrb.gmra.mxu0 %v6041_v45  ;;  %3028 = vmatmul.bf16.vlgmr.msrb.gmra.mxu2 %v6043_v46  ;;  %v4141_v58 = vor.u32 %v4694_v37, %v4138_v32 }
 0x2b4   : > { %3062 = vmatpush.bf16.msra.mxu0 %v4093_v29  ;;  %3076 = vmatpush.bf16.msra.mxu2 %v4221_v31  ;;  %v4157_v29 = vor.u32 %v4698_v21, %v4154_v22  ;;  %v4662_v31 = vld [vmem:[#allocation2 + $0x4c] sm:$0xf] }
 0x2b5   : > { %v4013_v43 = vor.u32 %v4662_v31, %v4010_v36 }
 0x2b6   : > { %3106 = vmatpush.bf16.msrb.mxu1 %v4445_v34  ;;  %3041 = vmatpush.bf16.msrb.mxu3 %v4233_v54  ;;  %v4730_v34 = vld [vmem:[#allocation2 + $0x26c] sm:$0xf] }
 0x2b7   : > { %v4285_v54 = vor.u32 %v4730_v34, %v4282_v39  ;;  %v3129_v39 = vperm.slane %v6065_v12, 1 }
 0x2b8   : > { %3063 = vmatpush.bf16.msra.mxu0 %v4077_v47  ;;  %3077 = vmatpush.bf16.msra.mxu2 %v4205_v49  ;;  %v3994_v47 = vld [vmem:[#allocation2 + $0x38] sm:$0xf0]  ;;  %v4690_v49 = vld [vmem:[#allocation2 + $0x12c] sm:$0xf] }
 0x2b9   : > { %3042 = vmatmul.bf16.vlgmr.msrb.gmra.mxu3 %v6047_v10 }
 0x2ba   : > { %3090 = vmatpush.bf16.msra.mxu3 %v4349_v60  ;;  %3107 = vmatpush.bf16.msrb.mxu1 %v4429_v61  ;;  %v3997_v60 = vor.u32 %v4658_v38, %v3994_v47  ;;  %v4125_v61 = vor.u32 %v4690_v49, %v4122_v51 }
 0x2bc   : > { %3064 = vmatpush.bf16.msra.mxu0 %v4061_v2  ;;  %3078 = vmatpush.bf16.msra.mxu2 %v4189_v5  ;;  %v4269_v2 = vor.u32 %v4726_v56, %v4266_v59  ;;  %v4722_v5 = vld [vmem:[#allocation2 + $0x22c] sm:$0xf] }
 0x2bd   : > { %v4253_v11 = vor.u32 %v4722_v5, %v4250_v7 }
 0x2be   : > { %3091 = vmatpush.bf16.msra.mxu3 %v4333_v4  ;;  %3108 = vmatpush.bf16.msrb.mxu1 %v4413_v13  ;;  %v4718_v4 = vld [vmem:[#allocation2 + $0x20c] sm:$0xf]  ;;  %v4234_v13 = vld [vmem:[#allocation2 + $0x218] sm:$0xf0] }
 0x2bf   : > { %v4237_v14 = vor.u32 %v4718_v4, %v4234_v13 }
 0x2c0   : > { %3065 = vmatpush.bf16.msra.mxu0 %v4045_v44  ;;  %3079 = vmatpush.bf16.msra.mxu2 %v4173_v18 }
 0x2c2   : > { %3092 = vmatpush.bf16.msra.mxu3 %v4317_v35  ;;  %3109 = vmatpush.bf16.msrb.mxu1 %v4397_v30 }
 0x2c4   : > { %3066 = vmatpush.bf16.msra.mxu0 %v4029_v28  ;;  %3080 = vmatpush.bf16.msra.mxu2 %v4157_v29 }
 0x2c6   : > { %3093 = vmatpush.bf16.msra.mxu3 %v4301_v3  ;;  %3110 = vmatpush.bf16.msrb.mxu1 %v4381_v33 }
 0x2c8   : > { %3067 = vmatpush.bf16.msra.mxu0 %v4013_v43  ;;  %3081 = vmatpush.bf16.msra.mxu2 %v4141_v58 }
 0x2ca   : > { %3094 = vmatpush.bf16.msra.mxu3 %v4285_v54  ;;  %3111 = vmatpush.bf16.msrb.mxu1 %v4365_v55 }
 0x2cc   : > { %3068 = vmatpush.bf16.msra.mxu0 %v3997_v60  ;;  %3082 = vmatpush.bf16.msra.mxu2 %v4125_v61 }
 0x2cd   : > { %3112 = vmatmul.bf16.vlgmr.msrb.gmra.mxu1 %v6038_v27 }
 0x2ce   : > { %3095 = vmatpush.bf16.msra.mxu3 %v4269_v2 }
 0x2d0   : > { %3069 = vmatpush.bf16.msra.mxu0 %v3981_v6  ;;  %3083 = vmatpush.bf16.msra.mxu2 %v4109_v8 }
 0x2d2   : > { %3096 = vmatpush.bf16.msra.mxu3 %v4253_v11 }
 0x2d3   : > { %3070 = vmatmul.bf16.vlgmr.msra.gmra.mxu0 %v6041_v45  ;;  %3084 = vmatmul.bf16.vlgmr.msra.gmra.mxu2 %v6043_v46  ;;  %v3128_v46 = vperm.slane %v6065_v12, 0 }
 0x2d6   : > { %3097 = vmatpush.bf16.msra.mxu3 %v4237_v14 }
 0x2d9   : > { %3098 = vmatmul.bf16.vlgmr.msra.gmra.mxu3 %v6047_v10 }
 0x30a   : > { %v2945_v16 = vpop.f32.mrf.mxu1 }
 0x310   : > { %v2903_v15 = vpop.f32.mrf.mxu0 }
 0x312   : > { %v2947_v45 = vpop.f32.mrf.mxu1 }
 0x316   : > { %v2917_v17 = vpop.f32.mrf.mxu2 }
 0x317   : > { %v2918_v27 = vadd.f32 %v2917_v17, %v2903_v15 }
 0x318   : > { %v2905_v44 = vpop.f32.mrf.mxu0 }
 0x31a   : > { %v3001_v29 = vpop.f32.mrf.mxu1 }
 0x31c   : > { %v2931_v18 = vpop.f32.mrf.mxu3 }
 0x31d   : > { %v2932_v20 = vadd.f32 %v2931_v18, %v2918_v27 }
 0x31e   : > { %v2919_v21 = vpop.f32.mrf.mxu2 }
 0x31f   : > { %v2946_v22 = vadd.f32 %v2945_v16, %v2932_v20  ;;  %v2920_v30 = vadd.f32 %v2919_v21, %v2905_v44  ;;  %v3131_v44 = vperm.slane %v6065_v12, 3 }
 0x320   : > { %v2959_v24 = vpop.f32.mrf.mxu0 }
 0x321   : > { %v3118_v10 = vadd.f32 %v2946_v22, %v6011_v25 }
 0x322   : > { %v3003_v42 = vpop.f32.mrf.mxu1 }
 0x323   : > { %v3136_v35 = vadd.f32 %v3128_v46, %v3118_v10 }
 0x324   : > { %v2933_v23 = vpop.f32.mrf.mxu3 }
 0x325   : > { %3144 = vst [vmem:[%s6073_s29] sm:$0xff] %v3136_v35  ;;  %v2934_v48 = vadd.f32 %v2933_v23, %v2920_v30 }
 0x326   : > { %v2973_v40 = vpop.f32.mrf.mxu2 }
 0x327   : > { %v2948_v28 = vadd.f32 %v2947_v45, %v2934_v48  ;;  %v2974_v36 = vadd.f32 %v2973_v40, %v2959_v24 }
 0x328   : > { %v2961_v33 = vpop.f32.mrf.mxu0 }
 0x329   : > { %v3122_v31 = vadd.f32 %v2948_v28, %v6017_v52 }
 0x32a   : > { %v3057_v59 = vpop.f32.mrf.mxu1 }
 0x32b   : > { %v3140_v25 = vadd.f32 %v3128_v46, %v3122_v31 }
 0x32c   : > { %v2987_v37 = vpop.f32.mrf.mxu3 }
 0x32d   : > { %3148 = vst [vmem:[%s6073_s29 + $0x20] sm:$0xff] %v3140_v25  ;;  %v2988_v32 = vadd.f32 %v2987_v37, %v2974_v36 }
 0x32e   : > { %v2975_v3 = vpop.f32.mrf.mxu2 }
 0x32f   : > { %v3002_v34 = vadd.f32 %v3001_v29, %v2988_v32  ;;  %v2976_v58 = vadd.f32 %v2975_v3, %v2961_v33 }
 0x330   : > { %v3015_v51 = vpop.f32.mrf.mxu0 }
 0x331   : > { %v3119_v41 = vadd.f32 %v3002_v34, %v6014_v53 }
 0x333   : > { %v3137_v43 = vadd.f32 %v3129_v39, %v3119_v41 }
 0x334   : > { %v2989_v38 = vpop.f32.mrf.mxu3 }
 0x335   : > { %3145 = vst [vmem:[%s6073_s29 + $0x8] sm:$0xff] %v3137_v43  ;;  %v2990_v47 = vadd.f32 %v2989_v38, %v2976_v58 }
 0x336   : > { %v3029_v49 = vpop.f32.mrf.mxu2 }
 0x337   : > { %v3004_v52 = vadd.f32 %v3003_v42, %v2990_v47  ;;  %v3030_v56 = vadd.f32 %v3029_v49, %v3015_v51 }
 0x338   : > { %v3017_v1 = vpop.f32.mrf.mxu0 }
 0x339   : > { %v3123_v54 = vadd.f32 %v3004_v52, %v6020_v9  ;;  %v3059_v9 = vpop.f32.mrf.mxu1 }
 0x33b   : > { %v3141_v55 = vadd.f32 %v3129_v39, %v3123_v54 }
 0x33c   : > { %v3043_v60 = vpop.f32.mrf.mxu3 }
 0x33d   : > { %3149 = vst [vmem:[%s6073_s29 + $0x28] sm:$0xff] %v3141_v55  ;;  %v3044_v61 = vadd.f32 %v3043_v60, %v3030_v56 }
 0x33e   : > { %v3031_v63 = vpop.f32.mrf.mxu2 }
 0x33f   : > { %v3058_v53 = vadd.f32 %v3057_v59, %v3044_v61  ;;  %v3032_v5 = vadd.f32 %v3031_v63, %v3017_v1 }
 0x341   : > { %v3120_v0 = vadd.f32 %v3058_v53, %v6023_v50 }
 0x343   : > { %v3138_v2 = vadd.f32 %v3130_v62, %v3120_v0 }
 0x344   : > { %v3045_v7 = vpop.f32.mrf.mxu3 }
 0x345   : > { %3146 = vst [vmem:[%s6073_s29 + $0x10] sm:$0xff] %v3138_v2  ;;  %v3046_v6 = vadd.f32 %v3045_v7, %v3032_v5 }
 0x347   : > { %v3060_v8 = vadd.f32 %v3059_v9, %v3046_v6 }
 0x349   : > { %v3124_v11 = vadd.f32 %v3060_v8, %v6031_v19 }
 0x34a   : > { %v3113_v16 = vpop.f32.mrf.mxu1 }
 0x34b   : > { %v3142_v4 = vadd.f32 %v3130_v62, %v3124_v11 }
 0x34d   : > { %3150 = vst [vmem:[%s6073_s29 + $0x30] sm:$0xff] %v3142_v4 }
 0x350   : > { %v3071_v14 = vpop.f32.mrf.mxu0 }
 0x352   : > { %v3115_v10 = vpop.f32.mrf.mxu1 }
 0x356   : > { %v3085_v13 = vpop.f32.mrf.mxu2 }
 0x357   : > { %v3086_v15 = vadd.f32 %v3085_v13, %v3071_v14 }
 0x358   : > { %v3073_v21 = vpop.f32.mrf.mxu0 }
 0x35c   : > { %v3099_v17 = vpop.f32.mrf.mxu3 }
 0x35d   : > { %v3100_v50 = vadd.f32 %v3099_v17, %v3086_v15 }
 0x35e   : > { %v3087_v18 = vpop.f32.mrf.mxu2 }
 0x35f   : > { %v3114_v27 = vadd.f32 %v3113_v16, %v3100_v50  ;;  %v3088_v22 = vadd.f32 %v3087_v18, %v3073_v21 }
 0x361   : > { %v3121_v20 = vadd.f32 %v3114_v27, %v6029_v57 }
 0x363   : > { %v3139_v45 = vadd.f32 %v3131_v44, %v3121_v20 }
 0x364   : > { %v3101_v19 = vpop.f32.mrf.mxu3 }
 0x365   : > { %3147 = vst [vmem:[%s6073_s29 + $0x18] sm:$0xff] %v3139_v45  ;;  %v3102_v46 = vadd.f32 %v3101_v19, %v3088_v22 }
 0x367   : > { %v3116_v35 = vadd.f32 %v3115_v10, %v3102_v46 }
 0x369   : > { %v3125_v30 = vadd.f32 %v3116_v35, %v6036_v26 }
 0x36b   : > { %v3143_v23 = vadd.f32 %v3131_v44, %v3125_v30 }
 0x36d   : > { %3151 = vst [vmem:[%s6073_s29 + $0x38] sm:$0xff] %v3143_v23 }
 0x36e PF: > { %s27_s21 = sadd.s32 1, %s4842_s21  }
 0x36f   : > { %p24_p7 = scmp.ge.s32.totalorder %s27_s21, 4  }
 0x371   :  { %26 = sbr.rel (!%p24_p7) target bundleno = 3 (0x3), region = 131 }
 0x376   :  { %3173 = vsyncpa [#allocation3], 1 }
 0x377   :  { %3175 = vsyncpa [#allocation3 + $0x1], 1 }

</bundles_post_ra>
